<compile_context>
chip_gen: v7x
topology: tpu7x:2x2x1
jax: 0.10.0
libtpu: 0.0.40
codegen_flags: <defaults>
</compile_context>

<pallas_src>
import functools

import jax
import jax.numpy as jnp
from jax import lax
from jax.experimental import pallas as pl
from jax.experimental.pallas import tpu as pltpu


def csa_kernel(x_ref, vext_ref, xh_ref, m_ref, gamma_ref, out_ref, *,
               probs_dtype, exp_dtype):
    """One (batch, query-row-tile) grid step.

    x_ref:     (1, c, n_pad)    low-level features, full (padded) key sequence
    vext_ref:  (1, C+1, n_pad)  precomputed Wv @ x_h with a 0/1 key-validity row
    xh_ref:    (1, C, tq)       residual columns for this query tile
    m_ref:     (c, c)           folded Wq^T @ Wk
    gamma_ref: (1, 1)           gamma scalar (SMEM)
    out_ref:   (1, C, tq)       column tile of the output
    """
    probs_dtype = jnp.dtype(probs_dtype)
    exp_dtype = jnp.dtype(exp_dtype)

    C = out_ref.shape[1]
    tq = out_ref.shape[2]
    qi = pl.program_id(1)
    start = pl.multiple_of(qi * tq, tq)

    x = x_ref[0]                                # (c, n_pad) keys, full sequence
    x_tile = x_ref[0, :, pl.ds(start, tq)]      # (c, tq)    query columns
    gamma = gamma_ref[0, 0]

    # Folded query/key projection: t = M^T @ x_tile  (c, tq).  Tiny matmul,
    # keep it in the input dtype with fp32 accumulation.
    t = lax.dot_general(m_ref[...], x_tile, (((0,), (0,)), ((), ())),
                        preferred_element_type=jnp.float32)

    # energy[j, i] = x[:, j]^T M x_tile[:, i]  -> (n_pad, tq).  Keys on the
    # sublane axis, queries on the lane axis; MXU fed in probs_dtype.
    energy = lax.dot_general(x.astype(probs_dtype), t.astype(probs_dtype),
                             (((0,), (0,)), ((), ())),
                             preferred_element_type=jnp.float32)

    # Per-query (column-wise) softmax statistics.  The exp's cast is fused so
    # p is produced directly in probs_dtype (single pass over (n_pad, tq)).
    e_max = jnp.max(energy, axis=0, keepdims=True)                    # (1, tq)
    shifted = energy - e_max
    if exp_dtype == probs_dtype:
        p = jnp.exp(shifted.astype(probs_dtype))                      # bf16 exp (v6e/v7x)
    else:
        p = jnp.exp(shifted.astype(exp_dtype)).astype(probs_dtype)    # fp32 exp (v5e)

    # Aggregate over keys.  The last row of v_ext is the key-validity row, so
    # row C of agg_ext is the softmax denominator, accumulated in fp32 on the
    # MXU (padded keys have zero v columns and zero validity -> ignored).
    agg_ext = lax.dot_general(vext_ref[0].astype(probs_dtype), p,
                              (((1,), (0,)), ((), ())),
                              preferred_element_type=jnp.float32)     # (C+1, tq)
    agg = agg_ext[:C, :]                                              # (C, tq)
    denom = agg_ext[C:C + 1, :]                                       # (1, tq)

    # Deferred normalization + residual: one (1, tq) scale per column.
    approx = probs_dtype != jnp.dtype(jnp.float32)
    scale = gamma * pl.reciprocal(denom, approx=approx)
    out_ref[0] = (agg * scale + xh_ref[0]).astype(out_ref.dtype)


def _pick_row_tile(n_pad, tq_max, batch):
    """Largest lane-dense (multiple of 128) query tile dividing n_pad."""
    tq = max(128, min((int(tq_max) // 128) * 128, n_pad))
    while n_pad % tq != 0:
        tq -= 128
    # v7x shards the "parallel" grid axes across 2 TensorCores: with batch==1
    # make sure the query axis supplies at least 2 steps.
    if batch == 1 and n_pad // tq < 2 and n_pad >= 256:
        tq = max(128, ((n_pad // 2) // 128) * 128)
        while n_pad % tq != 0:
            tq -= 128
    return tq


def csa_forward(x, x_h, wq, wk, wv, gamma, *, tq_max=256,
                probs_dtype=jnp.bfloat16, exp_dtype=None,
                vmem_limit_bytes=48 * 1024 * 1024):
    """x: (b, c, n), x_h: (b, C, N) with N == n (matches the PyTorch forward).

    On v5e pass exp_dtype=jnp.float32 (no bf16 EUP); on v5e/v6e (128 MiB VMEM)
    tq_max=512 and a larger vmem_limit_bytes are fine for large n.
    """
    b, c, n = x.shape
    bh, C, N = x_h.shape
    assert bh == b and N == n, "requires matching batch and N == n"

    if exp_dtype is None:
        exp_dtype = probs_dtype

    # Fold query/key 1x1 convs: energy = (Wq x)^T (Wk x) = x^T (Wq^T Wk) x.
    m = jnp.dot(wq.T, wk).astype(x.dtype)

    # Hoist the value projection out of the kernel (once per batch element).
    v = jnp.einsum("oc,bcn->bon", wv, x_h)                       # (b, C, n) fp32

    # Pad the sequence to a lane-dense multiple of 128.  Padded keys are
    # neutralized by zero-padded x / v and a zero entry in the validity row.
    n_pad = ((n + 127) // 128) * 128
    pad = n_pad - n
    if pad:
        x_p = jnp.pad(x, ((0, 0), (0, 0), (0, pad)))
        xh_p = jnp.pad(x_h, ((0, 0), (0, 0), (0, pad)))
        v_p = jnp.pad(v, ((0, 0), (0, 0), (0, pad)))
    else:
        x_p, xh_p, v_p = x, x_h, v
    ones_row = jnp.concatenate(
        [jnp.ones((b, 1, n), v.dtype), jnp.zeros((b, 1, pad), v.dtype)], axis=2)
    # (b, C+1, n_pad); stored in probs_dtype to halve its DMA/VMEM footprint.
    v_ext = jnp.concatenate([v_p, ones_row], axis=1).astype(probs_dtype)

    gamma_arr = jnp.asarray(gamma, jnp.float32).reshape(1, 1)

    tq = _pick_row_tile(n_pad, tq_max, b)
    grid = (b, n_pad // tq)

    kernel = functools.partial(csa_kernel, probs_dtype=probs_dtype,
                               exp_dtype=exp_dtype)

    out = pl.pallas_call(
        kernel,
        out_shape=jax.ShapeDtypeStruct((b, C, n_pad), x_h.dtype),
        grid=grid,
        in_specs=[
            # Full-sequence slabs; qi-invariant index maps so the pipeline only
            # re-DMAs them when the batch index changes.
            pl.BlockSpec((1, c, n_pad), lambda bi, qi: (bi, 0, 0)),        # x (keys)
            pl.BlockSpec((1, C + 1, n_pad), lambda bi, qi: (bi, 0, 0)),    # v_ext
            # Residual is only needed per query tile now.
            pl.BlockSpec((1, C, tq), lambda bi, qi: (bi, 0, qi)),          # x_h tile
            # Grid-invariant weight (constant block index -> no per-step DMA).
            pl.BlockSpec((c, c), lambda bi, qi: (0, 0)),                   # M = Wq^T Wk
            pl.BlockSpec(memory_space=pltpu.MemorySpace.SMEM),             # gamma
        ],
        out_specs=pl.BlockSpec((1, C, tq), lambda bi, qi: (bi, 0, qi)),
        compiler_params=pltpu.CompilerParams(
            dimension_semantics=("parallel", "parallel"),
            vmem_limit_bytes=vmem_limit_bytes),
    )(x_p, v_ext, xh_p, m, gamma_arr)

    # TODO(synk): for very large n on v7x (64 MiB VMEM), add a key-tile grid
    # axis with an online-softmax accumulator instead of full (n, tq) energy.
    return out[:, :, :n] if pad else out


def csa_reference(x, x_h, wq, wk, wv, gamma):
    """Pure-JAX reference mirroring the PyTorch forward (blinear=False)."""
    q = jnp.einsum("oc,bcn->bon", wq, x)            # query_conv
    k = jnp.einsum("oc,bcn->bon", wk, x)            # key_conv
    energy = jnp.einsum("bcn,bcm->bnm", q, k)       # (q^T @ k) per batch
    attn = jax.nn.softmax(energy, axis=-1)
    v = jnp.einsum("oc,bcn->bon", wv, x_h)          # value_conv
    out = jnp.einsum("bcn,bmn->bcm", v, attn)       # v @ attn^T
    return gamma * out + x_h


if __name__ == "__main__":
    key = jax.random.PRNGKey(0)
    k1, k2, k3, k4, k5, k6, k7 = jax.random.split(key, 7)

    b = 2          # batch
    c = 8          # qk_channel
    C = 16         # vx_channel
    n = 512        # sequence length (N == n) -> 2 query-row tiles of 256

    x = jax.random.normal(k1, (b, c, n), dtype=jnp.float32)
    x_h = jax.random.normal(k2, (b, C, n), dtype=jnp.float32)

    # Conv1d(kernel_size=1, bias=False) weights -> (out_channels, in_channels)
    wq = jax.random.normal(k3, (c, c), dtype=jnp.float32) * 0.1
    wk = jax.random.normal(k4, (c, c), dtype=jnp.float32) * 0.1
    wv = jax.random.normal(k5, (C, C), dtype=jnp.float32) * 0.1
    # nn.Parameter(torch.zeros(1)) initializes gamma to 0; use a nonzero value
    # here so the attention path actually contributes in the test.
    gamma = 0.5

    ref = csa_reference(x, x_h, wq, wk, wv, gamma)

    # fp32 MXU feed / exact reciprocal: tight check of the tiled algorithm.
    out_f32 = jax.block_until_ready(
        csa_forward(x, x_h, wq, wk, wv, gamma, probs_dtype=jnp.float32))
    assert out_f32.shape == (b, C, n)
    assert jnp.allclose(out_f32, ref, atol=5e-3, rtol=5e-3), "fp32 mismatch vs reference"

    # Default path (bf16 energy/probs/value MXU feed, bf16 exp): looser tolerance.
    out_bf16 = jax.block_until_ready(csa_forward(x, x_h, wq, wk, wv, gamma))
    assert out_bf16.shape == (b, C, n)
    assert jnp.allclose(out_bf16, ref, atol=3e-2, rtol=3e-2), "bf16 mismatch vs reference"

    # Ragged sequence (n % 128 != 0) + batch==1: exercises padding with masked
    # keys and the >=2-query-tile split for v7x's second TensorCore.
    n2 = 320
    x2 = jax.random.normal(k6, (1, c, n2), dtype=jnp.float32)
    xh2 = jax.random.normal(k7, (1, C, n2), dtype=jnp.float32)
    ref2 = csa_reference(x2, xh2, wq, wk, wv, gamma)
    out2 = jax.block_until_ready(
        csa_forward(x2, xh2, wq, wk, wv, gamma, probs_dtype=jnp.float32))
    assert out2.shape == (1, C, n2)
    assert jnp.allclose(out2, ref2, atol=5e-3, rtol=5e-3), "ragged-n mismatch vs reference"

    print("KERNEL_OK")
</pallas_src>

<mosaic_0001>
module attributes {stable_mosaic.version = 11 : i64} {
  func.func @csa_kernel(%arg0: i32, %arg1: i32, %arg2: memref<1x8x512xf32, #tpu.memory_space<vmem>>, %arg3: memref<1x17x512xf32, #tpu.memory_space<vmem>>, %arg4: memref<1x16x256xf32, #tpu.memory_space<vmem>>, %arg5: memref<8x8xf32, #tpu.memory_space<vmem>>, %arg6: memref<1x1xf32, #tpu.memory_space<smem>>, %arg7: memref<1x16x256xf32, #tpu.memory_space<vmem>>) attributes {dimension_semantics = [#tpu.dimension_semantics<parallel>, #tpu.dimension_semantics<parallel>], iteration_bounds = array<i64: 2, 2>, scalar_prefetch = 0 : i64, scratch_operands = 0 : i64, tpu.core_type = #tpu.core_type<tc>, window_params = [{transform_indices = @transform_0, window_bounds = array<i64: 1, 8, 512>}, {transform_indices = @transform_1, window_bounds = array<i64: 1, 17, 512>}, {transform_indices = @transform_2, window_bounds = array<i64: 1, 16, 256>}, {pipeline_mode = #tpu.pipeline_mode<synchronous>, transform_indices = @transform_3, window_bounds = array<i64: 8, 8>}, {transform_indices = @transform_4, window_bounds = array<i64: 1, 1>}, {transform_indices = @transform_5, window_bounds = array<i64: 1, 16, 256>}]} {
    %c256_i32 = arith.constant 256 : i32
    %0 = arith.muli %arg1, %c256_i32 : i32
    %1 = tpu.assume_multiple %0, 256 : i32
    %c0 = arith.constant 0 : index
    %c0_0 = arith.constant 0 : index
    %c0_1 = arith.constant 0 : index
    %2 = vector.load %arg2[%c0, %c0_0, %c0_1] : memref<1x8x512xf32, #tpu.memory_space<vmem>>, vector<1x8x512xf32>
    %3 = vector.shape_cast %2 : vector<1x8x512xf32> to vector<8x512xf32>
    %c0_2 = arith.constant 0 : index
    %c0_3 = arith.constant 0 : index
    %4 = arith.index_cast %1 : i32 to index
    %5 = vector.load %arg2[%c0_2, %c0_3, %4] : memref<1x8x512xf32, #tpu.memory_space<vmem>>, vector<1x8x256xf32>
    %6 = vector.shape_cast %5 : vector<1x8x256xf32> to vector<8x256xf32>
    %c0_4 = arith.constant 0 : index
    %c0_5 = arith.constant 0 : index
    %7 = memref.load %arg6[%c0_4, %c0_5] : memref<1x1xf32, #tpu.memory_space<smem>>
    %c0_6 = arith.constant 0 : index
    %c0_7 = arith.constant 0 : index
    %8 = vector.load %arg5[%c0_6, %c0_7] : memref<8x8xf32, #tpu.memory_space<vmem>>, vector<8x8xf32>
    %cst = arith.constant dense<0.000000e+00> : vector<8x256xf32>
    %9 = tpu.matmul %8, %6, %cst {dimension_numbers = #tpu.dot_dimension_numbers<[0], [0], [1], [1], [0, 1, 1, 1], [], []>} : vector<8x8xf32>, vector<8x256xf32>, vector<8x256xf32> -> vector<8x256xf32>
    %cst_8 = arith.constant dense<0.000000e+00> : vector<512x256xf32>
    %10 = tpu.matmul %3, %9, %cst_8 {dimension_numbers = #tpu.dot_dimension_numbers<[0], [0], [1], [1], [0, 1, 1, 1], [], []>} : vector<8x512xf32>, vector<8x256xf32>, vector<512x256xf32> -> vector<512x256xf32>
    %cst_9 = arith.constant dense<0xFF800000> : vector<256xf32>
    %11 = vector.multi_reduction <maximumf>, %10, %cst_9 [0] : vector<512x256xf32> to vector<256xf32>
    %12 = vector.shape_cast %11 : vector<256xf32> to vector<1x256xf32>
    %13 = vector.broadcast %12 : vector<1x256xf32> to vector<512x256xf32>
    %14 = arith.subf %10, %13 : vector<512x256xf32>
    %15 = math.exp %14 : vector<512x256xf32>
    %c0_10 = arith.constant 0 : index
    %c0_11 = arith.constant 0 : index
    %c0_12 = arith.constant 0 : index
    %16 = vector.load %arg3[%c0_10, %c0_11, %c0_12] : memref<1x17x512xf32, #tpu.memory_space<vmem>>, vector<1x17x512xf32>
    %17 = vector.shape_cast %16 : vector<1x17x512xf32> to vector<17x512xf32>
    %cst_13 = arith.constant dense<0.000000e+00> : vector<17x256xf32>
    %18 = tpu.matmul %17, %15, %cst_13 {dimension_numbers = #tpu.dot_dimension_numbers<[1], [0], [0], [1], [0, 0, 1, 1], [], []>} : vector<17x512xf32>, vector<512x256xf32>, vector<17x256xf32> -> vector<17x256xf32>
    %19 = vector.extract_strided_slice %18 {offsets = [0, 0], sizes = [16, 256], strides = [1, 1]} : vector<17x256xf32> to vector<16x256xf32>
    %20 = vector.extract_strided_slice %18 {offsets = [16, 0], sizes = [1, 256], strides = [1, 1]} : vector<17x256xf32> to vector<1x256xf32>
    %21 = tpu.reciprocal %20 : vector<1x256xf32> -> vector<1x256xf32>
    %22 = vector.broadcast %7 : f32 to vector<1x256xf32>
    %23 = arith.mulf %22, %21 : vector<1x256xf32>
    %24 = vector.broadcast %23 : vector<1x256xf32> to vector<16x256xf32>
    %25 = arith.mulf %19, %24 : vector<16x256xf32>
    %c0_14 = arith.constant 0 : index
    %c0_15 = arith.constant 0 : index
    %c0_16 = arith.constant 0 : index
    %26 = vector.load %arg4[%c0_14, %c0_15, %c0_16] : memref<1x16x256xf32, #tpu.memory_space<vmem>>, vector<1x16x256xf32>
    %27 = vector.shape_cast %26 : vector<1x16x256xf32> to vector<16x256xf32>
    %28 = arith.addf %25, %27 : vector<16x256xf32>
    %c0_17 = arith.constant 0 : index
    %c0_18 = arith.constant 0 : index
    %c0_19 = arith.constant 0 : index
    %29 = vector.load %arg7[%c0_17, %c0_18, %c0_19] : memref<1x16x256xf32, #tpu.memory_space<vmem>>, vector<1x16x256xf32>
    %30 = vector.shape_cast %29 : vector<1x16x256xf32> to vector<16x256xf32>
    %31 = vector.shape_cast %28 : vector<16x256xf32> to vector<1x16x256xf32>
    tpu.vector_store %arg7[%c0_17, %c0_18, %c0_19], %31 {strides = array<i32>} : memref<1x16x256xf32, #tpu.memory_space<vmem>>, vector<1x16x256xf32>,
    return
  }
  func.func @transform_0(%arg0: i32, %arg1: i32) -> (i32, i32, i32) {
    %c0_i32 = arith.constant 0 : i32
    %c0_i32_0 = arith.constant 0 : i32
    %c0_i32_1 = arith.constant 0 : i32
    return %arg0, %c0_i32, %c0_i32_0 : i32, i32, i32
  }
  func.func @transform_1(%arg0: i32, %arg1: i32) -> (i32, i32, i32) {
    %c0_i32 = arith.constant 0 : i32
    %c0_i32_0 = arith.constant 0 : i32
    %c0_i32_1 = arith.constant 0 : i32
    return %arg0, %c0_i32, %c0_i32_0 : i32, i32, i32
  }
  func.func @transform_2(%arg0: i32, %arg1: i32) -> (i32, i32, i32) {
    %c0_i32 = arith.constant 0 : i32
    %c0_i32_0 = arith.constant 0 : i32
    return %arg0, %c0_i32, %arg1 : i32, i32, i32
  }
  func.func @transform_3(%arg0: i32, %arg1: i32) -> (i32, i32) {
    %c0_i32 = arith.constant 0 : i32
    %c0_i32_0 = arith.constant 0 : i32
    %c0_i32_1 = arith.constant 0 : i32
    return %c0_i32, %c0_i32_0 : i32, i32
  }
  func.func @transform_4(%arg0: i32, %arg1: i32) -> (i32, i32) {
    %c0_i32 = arith.constant 0 : i32
    %c0_i32_0 = arith.constant 0 : i32
    %c0_i32_1 = arith.constant 0 : i32
    return %c0_i32, %c0_i32_0 : i32, i32
  }
  func.func @transform_5(%arg0: i32, %arg1: i32) -> (i32, i32, i32) {
    %c0_i32 = arith.constant 0 : i32
    %c0_i32_0 = arith.constant 0 : i32
    return %arg0, %c0_i32, %arg1 : i32, i32, i32
  }
}

</mosaic_0001>

<bundles_post_ra>
// kernel: tpu_custom_call.1
= control target key start
LH: loop header
LB: loop body
LE: loop exit
PB: predicated region body
PF: predicated region fallthrough
CT: control target
= control target key end

     0   :  { %s4568_s0 = inlined_call_operand.vmem [shape: f32[2,8,512], index: 0, kind: input, shape index: {}]   ;;  %s4569_s1 = inlined_call_operand.vmem [shape: f32[2,17,512], index: 1, kind: input, shape index: {}]   ;;  %s4570_s2 = inlined_call_operand.vmem [shape: f32[2,16,512], index: 2, kind: input, shape index: {}]   ;;  %s4571_s3 = inlined_call_operand.vmem [shape: f32[8,8], index: 3, kind: input, shape index: {}]   ;;  %s4572_s4 = inlined_call_operand.<no memory space> [shape: f32[1,1], index: 4, kind: input, shape index: {}]   ;;  %s4573_s5 = inlined_call_operand.hbm [shape: f32[2,16,512], index: 5, kind: output, shape index: {}]  }
   0x1   :  { %10 = sst [smem:[#allocation2]] %s4572_s4 }
   0x2   :  { %11 = vsyncpa [#allocation5], 0 }
   0x3   :  { %13 = vsyncpa [#allocation5 + $0x1], 0  ;;  %s2749_s20 = smov 0   ;;  %s2751_s21 = smov 0  }
   0x4   :  { %s2753_s22 = smov 0   ;;  %s2755_s23 = smov 0  }
   0x5   :  { %s2757_s24 = smov 0   ;;  %s2759_s25 = smov 0  }
   0x6   :  { %s2761_s26 = smov 0   ;;  %s2763_s27 = smov 0  }
   0x7 LB: > { %s2055_s4 = sadd.s32 4294967295, %s2709_s27   ;;  %s2056_s28 = sadd.s32 4294967294, %s2709_s27   ;;  %s2709_s27 = sphi %s2763_s27, %s19_s27   ;;  %s2705_s26 = sphi %s2761_s26, %s5162_s26   ;;  %s2701_s25 = sphi %s2759_s25, %s5161_s25   ;;  %s2697_s24 = sphi %s2757_s24, %s5160_s24   ;;  %s2693_s23 = sphi %s2755_s23, %s5159_s23   ;;  %s2689_s22 = sphi %s2753_s22, %s5158_s22   ;;  %s2685_s21 = sphi %s2751_s21, %s5157_s21   ;;  %s2681_s20 = sphi %s2749_s20, %s5156_s20  }
   0x8   : > { %s28_s29 = sadd.s32 1, %s2701_s25  ;;  %s31_s30 = sadd.s32 1, %s2705_s26 }
   0x9   : > { %p29_p0 = scmp.ge.s32.totalorder %s28_s29, 2  ;;  %p99_p1 = scmp.ne.s32.totalorder %s2689_s22, %s2685_s21 }
   0xa   : > { %p100_p2 = scmp.eq.s32.totalorder %s2709_s27, 0  ;;  %p173_p5 = scmp.eq.s32.totalorder %s2055_s4, 3 }
   0xb   : > { %s5164_s29 = smov (%p29_p0, %s28_s29), 0  ;;  %s5166_s30 = smov (!%p29_p0, %s31_s30), %s2705_s26 }
   0xc   : > { %s88_s6 = ssub.s32 %s2701_s25, %s5164_s29  ;;  %p2801_p3 = por %p100_p2, %p99_p1 }
   0xd   : > { %p33_p4 = scmp.ge.s32.totalorder %s5166_s30, 2  ;;  %p178_p6 = scmp.ne.s32.totalorder %s2685_s21, %s2681_s20 }
   0xe   : > { %p179_p7 = scmp.eq.s32.totalorder %s2056_s28, 3  ;;  %p2809_p8 = por %p173_p5, %p99_p1 }
   0xf   : > { %s5168_s30 = smov (%p33_p4, %s5166_s30), 0  ;;  %s92_s12 = sadd.s32 1, %s2689_s22 }
  0x10   : > { %p2813_p9 = por %p179_p7, %p178_p6  ;;  %s87_s10 = ssub.s32 %s2705_s26, %s5168_s30 }
  0x11   : > { %s89_s11 = sor.u32 %s88_s6, %s87_s10  ;;  %p2058_p11 = scmp.ge.s32.totalorder %s2709_s27, 4 }
  0x12   : > { %p90_p10 = scmp.eq.s32.totalorder %s89_s11, 0 }
  0x13   : > { %201 = sbr.rel (%p2058_p11) target bundleno = 35 (0x23), region = 24 }
  0x14   : > { %s2821_s13 = scalar_select %p90_p10, %s2689_s22, %s92_s12  }
  0x1a   : > { %220 = sbr.rel (!%p2801_p3) target bundleno = 35 (0x23), region = 36  ;;  %s222_s14 = sand.u32 (%p2801_p3), 1, %s2689_s22  }
  0x1b   : > { %s2060_s15 = sshll.u32 (%p2801_p3), %s2701_s25, 1  ;;  %s2059_s16 = sshll.u32 (%p2801_p3), %s222_s14, 5 }
  0x1c   : > { %s2061_s17 = sshll.u32 (%p2801_p3), %s2705_s26, 3  ;;  %s224_s10 = scalar_lea.vmem (%p2801_p3), [#allocation3], %s2059_s16 }
  0x1d   : > { %s227_s18 = sadd.s32 (%p2801_p3), %s2061_s17, %s2060_s15 }
  0x1e   : > { %s2062_s19 = sshll.u32 (%p2801_p3), %s227_s18, 3 }
  0x1f   : > { %s229_s6 = scalar_lea.vmem (%p2801_p3), %s4570_s2, %s2062_s19 }
  0x20   : > { %v242_v0 = vld [vmem:[%s229_s6] sm:$0xff] (%p2801_p3)  ;;  %v244_v1 = vld [vmem:[%s229_s6 + $0x8] sm:$0xff] (%p2801_p3) }
  0x21   : > { %v246_v2 = vld [vmem:[%s229_s6 + $0x20] sm:$0xff]  ;;  %243 = vst [vmem:[%s224_s10] sm:$0xff] %v242_v0  ;;  %245 = vst [vmem:[%s224_s10 + $0x8] sm:$0xff] %v244_v1  ;;  %v248_v3 = vld [vmem:[%s229_s6 + $0x28] sm:$0xff] }
  0x22   : > { %247 = vst [vmem:[%s224_s10 + $0x10] sm:$0xff] %v246_v2  ;;  %249 = vst [vmem:[%s224_s10 + $0x18] sm:$0xff] %v248_v3 }
  0x23 PF: > { %p2063_p12 = scmp.ge.s32.totalorder %s2709_s27, 1  ;;  %p254_p13 = scmp.lt.s32.totalorder %s2709_s27, 5 }
  0x25   : > { %p255_p0 = pnand %p2063_p12, %p254_p13 }
  0x27   : > { %258 = sbr.rel (%p255_p0) target bundleno = 1212 (0x4bc), region = 59 }
  0x2e   : > { %v322_v4 = vld [vmem:[%s4571_s3] sm:$0xff]  ;;  %p298_p1 = scmp.lt.s32.totalorder %s2697_s24, 1  ;;  %s2069_s12 = sshll.u32 %s2693_s23, 8  ;;  %v2711_v5 = vmov 0.0   ;;  %vm355_vm0 = vcmask 64512  }
  0x2f   : > { %323 = vxpose.xlu0.b32.start.end [1/1] (short) (narrow) %v322_v4, 8  ;;  %s315_s14 = sshra.s32 %s2069_s12, 7  ;;  %423 = vmatprep.mubr.f32.mxu0 %v2711_v5  ;;  %s321_s12 = sld [smem:[#allocation2]] }
  0x30   : > { %s2841_s15 = scalar_select %p298_p1, %s2697_s24, 1  ;;  %946 = vmatprep.mubr.f32.mxu1 %v2711_v5 }
  0x31   : > { %s2070_s16 = sshll.u32 %s315_s14, 3  ;;  %s261_s14 = sand.u32 1, %s2685_s21  }
  0x32   : > { %s2142_s17 = sshll.u32 %s2841_s15, 5  ;;  %s2279_s6 = smul.u32 96, %s2841_s15 }
  0x33   : > { %s302_s4 = scalar_lea.vmem %s4568_s0, %s2142_s17  ;;  %s2064_s15 = sshll.u32 %s261_s14, 5 }
  0x34   : > { %s318_s28 = scalar_lea.vmem %s302_s4, %s2070_s16  ;;  %v312_v6 = vld [vmem:[%s302_s4 + $0x8] sm:$0xff]  ;;  %v311_v7 = vld [vmem:[%s302_s4] sm:$0xff]  ;;  %v313_v10 = vld [vmem:[%s302_s4 + $0x10] sm:$0xff]  ;;  %s3637_s11 = scalar_lea.vmem %s4569_s1, %s2279_s6 }
  0x35   : > { %v320_v8 = vld [vmem:[%s318_s28 + $0x8] sm:$0xff]  ;;  %v319_v9 = vld [vmem:[%s318_s28] sm:$0xff]  ;;  %462 = vxpose.xlu0.b32.start.end [1/1] (short) %v312_v6, 128  ;;  %430 = vxpose.xlu1.b32.start.end [1/1] (short) %v311_v7, 128  ;;  %v314_v11 = vld [vmem:[%s302_s4 + $0x18] sm:$0xff]  ;;  %s2137_s16 = sshll.u32 %s2693_s23, 1  ;;  %s2138_s17 = sshll.u32 %s2697_s24, 3 }
  0x36   : > { %359 = vmatprep.subr.mxu0 %v320_v8  ;;  %s1941_s18 = sadd.s32 %s2138_s17, %s2137_s16  ;;  %s297_s19 = scalar_lea.vmem [#allocation4], %s2064_s15 }
  0x37   : > { %360 = vmatpush1.msra.mxu0 %v319_v9  ;;  %s1944_s4 = sshll.u32 %s297_s19, 4  ;;  %s263_s28 = scalar_lea.vmem [#allocation3], %s2064_s15  ;;  %s4507_s4 = int_to_ptr.vmem [resolvable:$true] %s1944_s4 }
  0x38   : > { %s2139_s6 = sshll.u32 %s1941_s18, 7  ;;  %s4516_s7 = scalar_lea.sflag [#allocation5], %s261_s14 }
  0x39   : > { %s4512_s10 = scalar_lea.hbm %s4573_s5, %s2139_s6 }
  0x72   : > { %494 = vxpose.xlu1.b32.start.end [1/1] (short) %v313_v10, 128  ;;  %526 = vxpose.xlu0.b32.start.end [1/1] (short) %v314_v11, 128 }
  0xaf   : > { %v339_v12 = vpop.trf.xlu0 }
  0xb0   : > { %2071 = vmatmul.mubr.msk.f32.vlgmr.msra.gmra.mrb[0].mxu0 %vm355_vm0, %v339_v12 }
  0xb1   : > { %814 = vmatprep.mubr.f32.mxu0 %v2711_v5 }
  0xb5   : > { %v446_v13 = vpop.trf.xlu1  ;;  %v2850_v19 = vpop.trf.xlu0 }
  0xb9   : > { %v447_v14 = vpop.trf.xlu1  ;;  %v2852_v21 = vpop.trf.xlu0 }
  0xbd   : > { %v448_v15 = vpop.trf.xlu1  ;;  %v2854_v23 = vpop.trf.xlu0 }
  0xc1   : > { %v449_v16 = vpop.trf.xlu1  ;;  %v2858_v25 = vpop.trf.xlu0 }
  0xc5   : > { %v450_v17 = vpop.trf.xlu1  ;;  %v2862_v27 = vpop.trf.xlu0 }
  0xc9   : > { %v451_v18 = vpop.trf.xlu1  ;;  %v2866_v29 = vpop.trf.xlu0 }
  0xcd   : > { %v452_v20 = vpop.trf.xlu1  ;;  %v484_v31 = vpop.trf.xlu0 }
  0xd1   : > { %v453_v22 = vpop.trf.xlu1  ;;  %v485_v33 = vpop.trf.xlu0 }
  0xd5   : > { %v2856_v24 = vpop.trf.xlu1  ;;  %v486_v35 = vpop.trf.xlu0 }
  0xd9   : > { %v2860_v26 = vpop.trf.xlu1  ;;  %v487_v39 = vpop.trf.xlu0 }
  0xdd   : > { %v2864_v28 = vpop.trf.xlu1  ;;  %v488_v41 = vpop.trf.xlu0 }
  0xe1   : > { %v2868_v30 = vpop.trf.xlu1  ;;  %v489_v43 = vpop.trf.xlu0 }
  0xe5   : > { %v2870_v32 = vpop.trf.xlu1  ;;  %v490_v45 = vpop.trf.xlu0 }
  0xe9   : > { %v2872_v34 = vpop.trf.xlu1  ;;  %v491_v47 = vpop.trf.xlu0 }
  0xed   : > { %v2874_v36 = vpop.trf.xlu1  ;;  %v492_v49 = vpop.trf.xlu0 }
  0xf1   : > { %v2880_v40 = vpop.trf.xlu1  ;;  %v493_v51 = vpop.trf.xlu0 }
  0xf5   : > { %v510_v42 = vpop.trf.xlu1  ;;  %v542_v58 = vpop.trf.xlu0 }
  0xf9   : > { %v511_v44 = vpop.trf.xlu1  ;;  %v543_v60 = vpop.trf.xlu0 }
  0xfd   : > { %v512_v46 = vpop.trf.xlu1  ;;  %v544_v62 = vpop.trf.xlu0 }
 0x101   : > { %v513_v48 = vpop.trf.xlu1  ;;  %v545_v0 = vpop.trf.xlu0 }
 0x105   : > { %v514_v50 = vpop.trf.xlu1  ;;  %v546_v2 = vpop.trf.xlu0 }
 0x109   : > { %v515_v52 = vpop.trf.xlu1  ;;  %v547_v4 = vpop.trf.xlu0 }
 0x10d   : > { %v516_v53 = vpop.trf.xlu1  ;;  %v548_v6 = vpop.trf.xlu0 }
 0x111   : > { %v517_v54 = vpop.trf.xlu1  ;;  %v549_v7 = vpop.trf.xlu0 }
 0x115   : > { %v518_v55 = vpop.trf.xlu1  ;;  %v550_v8 = vpop.trf.xlu0 }
 0x119   : > { %v519_v56 = vpop.trf.xlu1  ;;  %v551_v9 = vpop.trf.xlu0 }
 0x11d   : > { %v520_v57 = vpop.trf.xlu1  ;;  %v552_v10 = vpop.trf.xlu0 }
 0x121   : > { %v521_v59 = vpop.trf.xlu1  ;;  %v553_v11 = vpop.trf.xlu0 }
 0x125   : > { %v522_v61 = vpop.trf.xlu1  ;;  %v554_v12 = vpop.trf.xlu0 }
 0x129   : > { %v523_v63 = vpop.trf.xlu1 }
 0x12d   : > { %v524_v1 = vpop.trf.xlu1 }
 0x131   : > { %v525_v3 = vpop.trf.xlu1 }
 0x183   : > { %v425_v37 = vpop.f32.mrb[0].mxu0 }
 0x184   : > { %v427_v38 = vpop.f32.mrb[1].mxu0 }
 0x185   : > { %750 = vmatprep.subr.mxu0 %v427_v38  ;;  %2271 = vmatprep.subr.mxu1 %v427_v38 }
 0x186   : > { %751 = vmatpush1.msra.mxu0 %v425_v37  ;;  %2272 = vmatpush1.msra.mxu1 %v425_v37 }
 0x187   : > { %2072 = vmatmul.mubr.msk.f32.vlgmr.msra.gmra.mrb[2].mxu0 %vm355_vm0, %v446_v13  ;;  %2094 = vmatmul.mubr.msk.f32.vlgmr.msra.gmra.mrb[0].mxu1 %vm355_vm0, %v484_v31  ;;  %v555_v13 = vpop.trf.xlu0 }
 0x188   : > { %952 = vmatprep.mubr.f32.mxu1 %v2711_v5  ;;  %820 = vmatprep.mubr.f32.mxu0 %v2711_v5 }
 0x18b   : > { %2073 = vmatmul.mubr.msk.f32.gmra.mrb[4].mxu0 %vm355_vm0, %v447_v14  ;;  %2095 = vmatmul.mubr.msk.f32.gmra.mrb[2].mxu1 %vm355_vm0, %v485_v33  ;;  %v556_v14 = vpop.trf.xlu0 }
 0x18c   : > { %958 = vmatprep.mubr.f32.mxu1 %v2711_v5  ;;  %826 = vmatprep.mubr.f32.mxu0 %v2711_v5 }
 0x18f   : > { %2074 = vmatmul.mubr.msk.f32.gmra.mrb[6].mxu0 %vm355_vm0, %v448_v15  ;;  %2096 = vmatmul.mubr.msk.f32.gmra.mrb[4].mxu1 %vm355_vm0, %v486_v35  ;;  %v557_v15 = vpop.trf.xlu0 }
 0x190   : > { %964 = vmatprep.mubr.f32.mxu1 %v2711_v5  ;;  %832 = vmatprep.mubr.f32.mxu0 %v2711_v5 }
 0x193   : > { %2075 = vmatmul.mubr.msk.f32.gmra.mrb[8].mxu0 %vm355_vm0, %v449_v16  ;;  %2097 = vmatmul.mubr.msk.f32.gmra.mrb[6].mxu1 %vm355_vm0, %v487_v39 }
 0x194   : > { %970 = vmatprep.mubr.f32.mxu1 %v2711_v5  ;;  %838 = vmatprep.mubr.f32.mxu0 %v2711_v5 }
 0x197   : > { %2076 = vmatmul.mubr.msk.f32.gmra.mrb[10].mxu0 %vm355_vm0, %v450_v17  ;;  %2098 = vmatmul.mubr.msk.f32.gmra.mrb[8].mxu1 %vm355_vm0, %v488_v41 }
 0x198   : > { %976 = vmatprep.mubr.f32.mxu1 %v2711_v5  ;;  %844 = vmatprep.mubr.f32.mxu0 %v2711_v5 }
 0x19b   : > { %2077 = vmatmul.mubr.msk.f32.gmra.mrb[12].mxu0 %vm355_vm0, %v451_v18  ;;  %2099 = vmatmul.mubr.msk.f32.gmra.mrb[10].mxu1 %vm355_vm0, %v489_v43 }
 0x19c   : > { %982 = vmatprep.mubr.f32.mxu1 %v2711_v5  ;;  %850 = vmatprep.mubr.f32.mxu0 %v2711_v5 }
 0x19f   : > { %2078 = vmatmul.mubr.msk.f32.gmra.mrb[14].mxu0 %vm355_vm0, %v452_v20  ;;  %2100 = vmatmul.mubr.msk.f32.gmra.mrb[12].mxu1 %vm355_vm0, %v490_v45 }
 0x1a0   : > { %988 = vmatprep.mubr.f32.mxu1 %v2711_v5  ;;  %856 = vmatprep.mubr.f32.mxu0 %v2711_v5 }
 0x1a3   : > { %2079 = vmatmul.mubr.msk.f32.gmra.mrb[16].mxu0 %vm355_vm0, %v453_v22  ;;  %2101 = vmatmul.mubr.msk.f32.gmra.mrb[14].mxu1 %vm355_vm0, %v491_v47 }
 0x1a4   : > { %994 = vmatprep.mubr.f32.mxu1 %v2711_v5  ;;  %862 = vmatprep.mubr.f32.mxu0 %v2711_v5 }
 0x1a7   : > { %2080 = vmatmul.mubr.msk.f32.gmra.mrb[18].mxu0 %vm355_vm0, %v2856_v24  ;;  %2102 = vmatmul.mubr.msk.f32.gmra.mrb[16].mxu1 %vm355_vm0, %v492_v49 }
 0x1a8   : > { %1000 = vmatprep.mubr.f32.mxu1 %v2711_v5  ;;  %868 = vmatprep.mubr.f32.mxu0 %v2711_v5 }
 0x1ab   : > { %2081 = vmatmul.mubr.msk.f32.gmra.mrb[20].mxu0 %vm355_vm0, %v2860_v26  ;;  %2103 = vmatmul.mubr.msk.f32.gmra.mrb[18].mxu1 %vm355_vm0, %v493_v51 }
 0x1ac   : > { %874 = vmatprep.mubr.f32.mxu0 %v2711_v5  ;;  %1006 = vmatprep.mubr.f32.mxu1 %v2711_v5 }
 0x1af   : > { %2082 = vmatmul.mubr.msk.f32.gmra.mrb[22].mxu0 %vm355_vm0, %v2864_v28  ;;  %2104 = vmatmul.mubr.msk.f32.gmra.mrb[20].mxu1 %vm355_vm0, %v510_v42 }
 0x1b0   : > { %880 = vmatprep.mubr.f32.mxu0 %v2711_v5  ;;  %1012 = vmatprep.mubr.f32.mxu1 %v2711_v5 }
 0x1b3   : > { %2083 = vmatmul.mubr.msk.f32.gmra.mrb[24].mxu0 %vm355_vm0, %v2868_v30  ;;  %2105 = vmatmul.mubr.msk.f32.gmra.mrb[22].mxu1 %vm355_vm0, %v511_v44 }
 0x1b4   : > { %886 = vmatprep.mubr.f32.mxu0 %v2711_v5  ;;  %1018 = vmatprep.mubr.f32.mxu1 %v2711_v5 }
 0x1b7   : > { %2084 = vmatmul.mubr.msk.f32.gmra.mrb[26].mxu0 %vm355_vm0, %v2870_v32  ;;  %2106 = vmatmul.mubr.msk.f32.gmra.mrb[24].mxu1 %vm355_vm0, %v512_v46 }
 0x1b8   : > { %892 = vmatprep.mubr.f32.mxu0 %v2711_v5  ;;  %1024 = vmatprep.mubr.f32.mxu1 %v2711_v5 }
 0x1bb   : > { %2085 = vmatmul.mubr.msk.f32.gmra.mrb[28].mxu0 %vm355_vm0, %v2872_v34  ;;  %2107 = vmatmul.mubr.msk.f32.gmra.mrb[26].mxu1 %vm355_vm0, %v513_v48 }
 0x1bc   : > { %898 = vmatprep.mubr.f32.mxu0 %v2711_v5  ;;  %1030 = vmatprep.mubr.f32.mxu1 %v2711_v5 }
 0x1bf   : > { %2086 = vmatmul.mubr.msk.f32.gmra.mrb[30].mxu0 %vm355_vm0, %v2874_v36  ;;  %2108 = vmatmul.mubr.msk.f32.gmra.mrb[28].mxu1 %vm355_vm0, %v514_v50 }
 0x1c0   : > { %904 = vmatprep.mubr.f32.mxu0 %v2711_v5  ;;  %1036 = vmatprep.mubr.f32.mxu1 %v2711_v5 }
 0x1c3   : > { %2087 = vmatmul.mubr.msk.f32.gmra.mrb[32].mxu0 %vm355_vm0, %v2880_v40  ;;  %2109 = vmatmul.mubr.msk.f32.gmra.mrb[30].mxu1 %vm355_vm0, %v515_v52 }
 0x1c4   : > { %910 = vmatprep.mubr.f32.mxu0 %v2711_v5  ;;  %1042 = vmatprep.mubr.f32.mxu1 %v2711_v5 }
 0x1c7   : > { %2088 = vmatmul.mubr.msk.f32.gmra.mrb[34].mxu0 %vm355_vm0, %v2850_v19  ;;  %2110 = vmatmul.mubr.msk.f32.gmra.mrb[32].mxu1 %vm355_vm0, %v516_v53 }
 0x1c8   : > { %916 = vmatprep.mubr.f32.mxu0 %v2711_v5  ;;  %1048 = vmatprep.mubr.f32.mxu1 %v2711_v5 }
 0x1cb   : > { %2089 = vmatmul.mubr.msk.f32.gmra.mrb[36].mxu0 %vm355_vm0, %v2852_v21  ;;  %2111 = vmatmul.mubr.msk.f32.gmra.mrb[34].mxu1 %vm355_vm0, %v517_v54 }
 0x1cc   : > { %922 = vmatprep.mubr.f32.mxu0 %v2711_v5  ;;  %1054 = vmatprep.mubr.f32.mxu1 %v2711_v5 }
 0x1cf   : > { %2090 = vmatmul.mubr.msk.f32.gmra.mrb[38].mxu0 %vm355_vm0, %v2854_v23  ;;  %2112 = vmatmul.mubr.msk.f32.gmra.mrb[36].mxu1 %vm355_vm0, %v518_v55 }
 0x1d0   : > { %928 = vmatprep.mubr.f32.mxu0 %v2711_v5  ;;  %1060 = vmatprep.mubr.f32.mxu1 %v2711_v5 }
 0x1d3   : > { %2091 = vmatmul.mubr.msk.f32.gmra.mrb[40].mxu0 %vm355_vm0, %v2858_v25  ;;  %2113 = vmatmul.mubr.msk.f32.gmra.mrb[38].mxu1 %vm355_vm0, %v519_v56 }
 0x1d4   : > { %934 = vmatprep.mubr.f32.mxu0 %v2711_v5  ;;  %1066 = vmatprep.mubr.f32.mxu1 %v2711_v5 }
 0x1d7   : > { %2092 = vmatmul.mubr.msk.f32.gmra.mrb[42].mxu0 %vm355_vm0, %v2862_v27  ;;  %2114 = vmatmul.mubr.msk.f32.gmra.mrb[40].mxu1 %vm355_vm0, %v520_v57 }
 0x1d8   : > { %940 = vmatprep.mubr.f32.mxu0 %v2711_v5  ;;  %1072 = vmatprep.mubr.f32.mxu1 %v2711_v5 }
 0x1db   : > { %2093 = vmatmul.mubr.msk.f32.gmra.mrb[44].mxu0 %vm355_vm0, %v2866_v29  ;;  %2115 = vmatmul.mubr.msk.f32.gmra.mrb[42].mxu1 %vm355_vm0, %v521_v59 }
 0x1dc   : > { %1078 = vmatprep.mubr.f32.mxu1 %v2711_v5 }
 0x1df   : > { %2116 = vmatmul.mubr.msk.f32.gmra.mrb[44].mxu1 %vm355_vm0, %v522_v61 }
 0x1e0   : > { %1084 = vmatprep.mubr.f32.mxu1 %v2711_v5 }
 0x1e3   : > { %2117 = vmatmul.mubr.msk.f32.gmra.mrb[46].mxu1 %vm355_vm0, %v523_v63 }
 0x1e4   : > { %1090 = vmatprep.mubr.f32.mxu1 %v2711_v5 }
 0x1e7   : > { %2118 = vmatmul.mubr.msk.f32.gmra.mrb[48].mxu1 %vm355_vm0, %v524_v1 }
 0x1e8   : > { %1096 = vmatprep.mubr.f32.mxu1 %v2711_v5 }
 0x1eb   : > { %2119 = vmatmul.mubr.msk.f32.gmra.mrb[50].mxu1 %vm355_vm0, %v525_v3 }
 0x1ec   : > { %1102 = vmatprep.mubr.f32.mxu1 %v2711_v5 }
 0x1ef   : > { %2120 = vmatmul.mubr.msk.f32.gmra.mrb[52].mxu1 %vm355_vm0, %v542_v58 }
 0x1f0   : > { %1108 = vmatprep.mubr.f32.mxu1 %v2711_v5 }
 0x1f3   : > { %2121 = vmatmul.mubr.msk.f32.gmra.mrb[54].mxu1 %vm355_vm0, %v543_v60 }
 0x1f4   : > { %1114 = vmatprep.mubr.f32.mxu1 %v2711_v5 }
 0x1f7   : > { %2122 = vmatmul.mubr.msk.f32.gmra.mrb[56].mxu1 %vm355_vm0, %v544_v62 }
 0x1f8   : > { %1120 = vmatprep.mubr.f32.mxu1 %v2711_v5 }
 0x1fb   : > { %2123 = vmatmul.mubr.msk.f32.gmra.mrb[58].mxu1 %vm355_vm0, %v545_v0 }
 0x1fc   : > { %1126 = vmatprep.mubr.f32.mxu1 %v2711_v5 }
 0x1ff   : > { %2124 = vmatmul.mubr.msk.f32.gmra.mrb[60].mxu1 %vm355_vm0, %v546_v2 }
 0x200   : > { %1132 = vmatprep.mubr.f32.mxu1 %v2711_v5 }
 0x203   : > { %2125 = vmatmul.mubr.msk.f32.gmra.mrb[62].mxu1 %vm355_vm0, %v547_v4 }
 0x204   : > { %1138 = vmatprep.mubr.f32.mxu1 %v2711_v5 }
 0x207   : > { %2126 = vmatmul.mubr.msk.f32.gmra.mrb[64].mxu1 %vm355_vm0, %v548_v6 }
 0x208   : > { %1144 = vmatprep.mubr.f32.mxu1 %v2711_v5 }
 0x20b   : > { %2127 = vmatmul.mubr.msk.f32.gmra.mrb[66].mxu1 %vm355_vm0, %v549_v7 }
 0x20c   : > { %1150 = vmatprep.mubr.f32.mxu1 %v2711_v5 }
 0x20f   : > { %2128 = vmatmul.mubr.msk.f32.gmra.mrb[68].mxu1 %vm355_vm0, %v550_v8 }
 0x210   : > { %1156 = vmatprep.mubr.f32.mxu1 %v2711_v5 }
 0x213   : > { %2129 = vmatmul.mubr.msk.f32.gmra.mrb[70].mxu1 %vm355_vm0, %v551_v9 }
 0x214   : > { %1162 = vmatprep.mubr.f32.mxu1 %v2711_v5 }
 0x217   : > { %2130 = vmatmul.mubr.msk.f32.gmra.mrb[72].mxu1 %vm355_vm0, %v552_v10 }
 0x218   : > { %1168 = vmatprep.mubr.f32.mxu1 %v2711_v5 }
 0x21b   : > { %2131 = vmatmul.mubr.msk.f32.gmra.mrb[74].mxu1 %vm355_vm0, %v553_v11 }
 0x21c   : > { %1174 = vmatprep.mubr.f32.mxu1 %v2711_v5 }
 0x21f   : > { %2132 = vmatmul.mubr.msk.f32.gmra.mrb[76].mxu1 %vm355_vm0, %v554_v12 }
 0x220   : > { %1180 = vmatprep.mubr.f32.mxu1 %v2711_v5 }
 0x223   : > { %2133 = vmatmul.mubr.msk.f32.gmra.mrb[78].mxu1 %vm355_vm0, %v555_v13 }
 0x224   : > { %1186 = vmatprep.mubr.f32.mxu1 %v2711_v5 }
 0x227   : > { %2134 = vmatmul.mubr.msk.f32.gmra.mrb[80].mxu1 %vm355_vm0, %v556_v14 }
 0x228   : > { %1192 = vmatprep.mubr.f32.mxu1 %v2711_v5 }
 0x22b   : > { %2135 = vmatmul.mubr.msk.f32.gmra.mrb[82].mxu1 %vm355_vm0, %v557_v15 }
 0x25a   : > { %v3018_v16 = vpop.f32.mrb[2].mxu0  ;;  %v3020_v17 = vpop.f32.mrb[0].mxu1 }
 0x25b   : > { %v3022_v18 = vpop.f32.mrb[3].mxu0  ;;  %v3024_v19 = vpop.f32.mrb[1].mxu1 }
 0x25c   : > { %4759 = vst [vmem:[#allocation7_spill] sm:$0xff] %v3022_v18  ;;  %4760 = vst [vmem:[#allocation8_spill] sm:$0xff] %v3024_v19 }
 0x25e   : > { %v3026_v20 = vpop.f32.mrb[4].mxu0  ;;  %v3028_v21 = vpop.f32.mrb[2].mxu1 }
 0x25f   : > { %v1219_v22 = vmax.f32 %v3028_v21, %v3020_v17  ;;  %v3032_v23 = vpop.f32.mrb[5].mxu0  ;;  %v3034_v5 = vpop.f32.mrb[3].mxu1 }
 0x260   : > { %4761 = vst [vmem:[#allocation9_spill] sm:$0xff] %v3032_v23  ;;  %4762 = vst [vmem:[#allocation10_spill] sm:$0xff] %v3034_v5  ;;  %v1288_v24 = vmax.f32 %v3034_v5, %v3024_v19 }
 0x262   : > { %v3038_v25 = vpop.f32.mrb[6].mxu0  ;;  %v3040_v26 = vpop.f32.mrb[4].mxu1 }
 0x263   : > { %4763 = vst [vmem:[#allocation11_spill] sm:$0xff] %v3040_v26  ;;  %v1199_v27 = vmax.f32 %v3018_v16, %v3038_v25  ;;  %v1221_v28 = vmax.f32 %v1219_v22, %v3040_v26  ;;  %v3045_v29 = vpop.f32.mrb[7].mxu0  ;;  %v3047_v30 = vpop.f32.mrb[5].mxu1  ;;  %v1722_v26 = vld [vmem:[%s3637_s11 + $0x8] sm:$0xff] }
 0x264   : > { %4764 = vst [vmem:[#allocation12_spill] sm:$0xff] %v3045_v29  ;;  %4765 = vst [vmem:[#allocation13_spill] sm:$0xff] %v3047_v30  ;;  %v1268_v31 = vmax.f32 %v3022_v18, %v3045_v29  ;;  %v1290_v32 = vmax.f32 %v1288_v24, %v3047_v30  ;;  %1797 = vmatprep.mubr.f32.mxu0 %v1722_v26 }
 0x266   : > { %v3052_v33 = vpop.f32.mrb[8].mxu0  ;;  %v3054_v34 = vpop.f32.mrb[6].mxu1 }
 0x267   : > { %4766 = vst [vmem:[#allocation14_spill] sm:$0xff] %v3054_v34  ;;  %v1200_v35 = vmax.f32 %v3026_v20, %v3052_v33  ;;  %v1223_v36 = vmax.f32 %v1221_v28, %v3054_v34  ;;  %v3059_v37 = vpop.f32.mrb[9].mxu0  ;;  %v3061_v38 = vpop.f32.mrb[7].mxu1 }
 0x268   : > { %4767 = vst [vmem:[#allocation15_spill] sm:$0xff] %v3059_v37  ;;  %4768 = vst [vmem:[#allocation16_spill] sm:$0xff] %v3061_v38  ;;  %v1269_v39 = vmax.f32 %v3032_v23, %v3059_v37  ;;  %v1292_v40 = vmax.f32 %v1290_v32, %v3061_v38 }
 0x26a   : > { %v3066_v41 = vpop.f32.mrb[10].mxu0  ;;  %v3068_v42 = vpop.f32.mrb[8].mxu1 }
 0x26b   : > { %4769 = vst [vmem:[#allocation17_spill] sm:$0xff] %v3068_v42  ;;  %v1201_v43 = vmax.f32 %v1199_v27, %v3066_v41  ;;  %v1225_v44 = vmax.f32 %v1223_v36, %v3068_v42  ;;  %v3072_v45 = vpop.f32.mrb[11].mxu0  ;;  %v3074_v46 = vpop.f32.mrb[9].mxu1 }
 0x26c   : > { %4770 = vst [vmem:[#allocation18_spill] sm:$0xff] %v3072_v45  ;;  %4771 = vst [vmem:[#allocation19_spill] sm:$0xff] %v3074_v46  ;;  %v1270_v47 = vmax.f32 %v1268_v31, %v3072_v45  ;;  %v1294_v48 = vmax.f32 %v1292_v40, %v3074_v46 }
 0x26e   : > { %v3078_v49 = vpop.f32.mrb[12].mxu0  ;;  %v3080_v50 = vpop.f32.mrb[10].mxu1 }
 0x26f   : > { %4772 = vst [vmem:[#allocation20_spill] sm:$0xff] %v3080_v50  ;;  %v1202_v51 = vmax.f32 %v1200_v35, %v3078_v49  ;;  %v1227_v52 = vmax.f32 %v1225_v44, %v3080_v50  ;;  %v3084_v53 = vpop.f32.mrb[13].mxu0  ;;  %v3086_v54 = vpop.f32.mrb[11].mxu1 }
 0x270   : > { %4773 = vst [vmem:[#allocation21_spill] sm:$0xff] %v3084_v53  ;;  %4774 = vst [vmem:[#allocation22_spill] sm:$0xff] %v3086_v54  ;;  %v1271_v55 = vmax.f32 %v1269_v39, %v3084_v53  ;;  %v1296_v56 = vmax.f32 %v1294_v48, %v3086_v54 }
 0x272   : > { %v3090_v57 = vpop.f32.mrb[14].mxu0  ;;  %v3092_v58 = vpop.f32.mrb[12].mxu1 }
 0x273   : > { %4775 = vst [vmem:[#allocation23_spill] sm:$0xff] %v3092_v58  ;;  %v1203_v59 = vmax.f32 %v1201_v43, %v3090_v57  ;;  %v1229_v60 = vmax.f32 %v1227_v52, %v3092_v58  ;;  %v3096_v61 = vpop.f32.mrb[15].mxu0  ;;  %v3098_v62 = vpop.f32.mrb[13].mxu1 }
 0x274   : > { %4776 = vst [vmem:[#allocation24_spill] sm:$0xff] %v3096_v61  ;;  %4777 = vst [vmem:[#allocation25_spill] sm:$0xff] %v3098_v62  ;;  %v1272_v63 = vmax.f32 %v1270_v47, %v3096_v61  ;;  %v1298_v0 = vmax.f32 %v1296_v56, %v3098_v62 }
 0x276   : > { %v3102_v1 = vpop.f32.mrb[16].mxu0  ;;  %v3104_v2 = vpop.f32.mrb[14].mxu1 }
 0x277   : > { %4778 = vst [vmem:[#allocation26_spill] sm:$0xff] %v3104_v2  ;;  %v1204_v3 = vmax.f32 %v1202_v51, %v3102_v1  ;;  %v1231_v4 = vmax.f32 %v1229_v60, %v3104_v2  ;;  %v3108_v6 = vpop.f32.mrb[17].mxu0  ;;  %v3110_v7 = vpop.f32.mrb[15].mxu1 }
 0x278   : > { %4779 = vst [vmem:[#allocation27_spill] sm:$0xff] %v3108_v6  ;;  %4780 = vst [vmem:[#allocation28_spill] sm:$0xff] %v3110_v7  ;;  %v1273_v8 = vmax.f32 %v1271_v55, %v3108_v6  ;;  %v1300_v9 = vmax.f32 %v1298_v0, %v3110_v7 }
 0x27a   : > { %v3114_v10 = vpop.f32.mrb[18].mxu0  ;;  %v3116_v11 = vpop.f32.mrb[16].mxu1 }
 0x27b   : > { %4781 = vst [vmem:[#allocation29_spill] sm:$0xff] %v3116_v11  ;;  %v1205_v12 = vmax.f32 %v1203_v59, %v3114_v10  ;;  %v1233_v13 = vmax.f32 %v1231_v4, %v3116_v11  ;;  %v3120_v14 = vpop.f32.mrb[19].mxu0  ;;  %v3122_v15 = vpop.f32.mrb[17].mxu1 }
 0x27c   : > { %4782 = vst [vmem:[#allocation30_spill] sm:$0xff] %v3120_v14  ;;  %4783 = vst [vmem:[#allocation31_spill] sm:$0xff] %v3122_v15  ;;  %v1274_v22 = vmax.f32 %v1272_v63, %v3120_v14  ;;  %v1302_v24 = vmax.f32 %v1300_v9, %v3122_v15 }
 0x27e   : > { %v3126_v27 = vpop.f32.mrb[20].mxu0  ;;  %v3128_v28 = vpop.f32.mrb[18].mxu1 }
 0x27f   : > { %4784 = vst [vmem:[#allocation32_spill] sm:$0xff] %v3128_v28  ;;  %v1206_v31 = vmax.f32 %v1204_v3, %v3126_v27  ;;  %v1235_v32 = vmax.f32 %v1233_v13, %v3128_v28  ;;  %v3132_v35 = vpop.f32.mrb[21].mxu0  ;;  %v3134_v36 = vpop.f32.mrb[19].mxu1 }
 0x280   : > { %4785 = vst [vmem:[#allocation33_spill] sm:$0xff] %v3132_v35  ;;  %4786 = vst [vmem:[#allocation34_spill] sm:$0xff] %v3134_v36  ;;  %v1275_v39 = vmax.f32 %v1273_v8, %v3132_v35  ;;  %v1304_v40 = vmax.f32 %v1302_v24, %v3134_v36 }
 0x282   : > { %v3138_v43 = vpop.f32.mrb[22].mxu0  ;;  %v3140_v44 = vpop.f32.mrb[20].mxu1 }
 0x283   : > { %4787 = vst [vmem:[#allocation35_spill] sm:$0xff] %v3140_v44  ;;  %v1207_v47 = vmax.f32 %v1205_v12, %v3138_v43  ;;  %v1237_v48 = vmax.f32 %v1235_v32, %v3140_v44  ;;  %v3144_v51 = vpop.f32.mrb[23].mxu0  ;;  %v3146_v52 = vpop.f32.mrb[21].mxu1 }
 0x284   : > { %4788 = vst [vmem:[#allocation36_spill] sm:$0xff] %v3144_v51  ;;  %4789 = vst [vmem:[#allocation37_spill] sm:$0xff] %v3146_v52  ;;  %v1276_v55 = vmax.f32 %v1274_v22, %v3144_v51  ;;  %v1306_v56 = vmax.f32 %v1304_v40, %v3146_v52 }
 0x286   : > { %v3150_v59 = vpop.f32.mrb[24].mxu0  ;;  %v3152_v60 = vpop.f32.mrb[22].mxu1 }
 0x287   : > { %4790 = vst [vmem:[#allocation38_spill] sm:$0xff] %v3152_v60  ;;  %v1208_v63 = vmax.f32 %v1206_v31, %v3150_v59  ;;  %v1239_v0 = vmax.f32 %v1237_v48, %v3152_v60  ;;  %v3156_v3 = vpop.f32.mrb[25].mxu0  ;;  %v3158_v4 = vpop.f32.mrb[23].mxu1 }
 0x288   : > { %4791 = vst [vmem:[#allocation39_spill] sm:$0xff] %v3156_v3  ;;  %4792 = vst [vmem:[#allocation40_spill] sm:$0xff] %v3158_v4  ;;  %v1277_v8 = vmax.f32 %v1275_v39, %v3156_v3  ;;  %v1308_v9 = vmax.f32 %v1306_v56, %v3158_v4 }
 0x28a   : > { %v3162_v12 = vpop.f32.mrb[26].mxu0  ;;  %v3164_v13 = vpop.f32.mrb[24].mxu1 }
 0x28b   : > { %4793 = vst [vmem:[#allocation41_spill] sm:$0xff] %v3164_v13  ;;  %v1209_v22 = vmax.f32 %v1207_v47, %v3162_v12  ;;  %v1220_v24 = vmax.f32 %v3164_v13, %v1239_v0  ;;  %v3168_v32 = vpop.f32.mrb[27].mxu0  ;;  %v3170_v31 = vpop.f32.mrb[25].mxu1 }
 0x28c   : > { %4794 = vst [vmem:[#allocation42_spill] sm:$0xff] %v3168_v32  ;;  %4795 = vst [vmem:[#allocation43_spill] sm:$0xff] %v3170_v31  ;;  %v1278_v40 = vmax.f32 %v1276_v55, %v3168_v32  ;;  %v1289_v48 = vmax.f32 %v3170_v31, %v1308_v9 }
 0x28e   : > { %v3174_v52 = vpop.f32.mrb[28].mxu0  ;;  %v3176_v39 = vpop.f32.mrb[26].mxu1 }
 0x28f   : > { %4796 = vst [vmem:[#allocation44_spill] sm:$0xff] %v3176_v39  ;;  %v1210_v56 = vmax.f32 %v1208_v63, %v3174_v52  ;;  %v1222_v4 = vmax.f32 %v1220_v24, %v3176_v39  ;;  %v3180_v36 = vpop.f32.mrb[29].mxu0  ;;  %v3182_v47 = vpop.f32.mrb[27].mxu1 }
 0x290   : > { %4797 = vst [vmem:[#allocation45_spill] sm:$0xff] %v3180_v36  ;;  %4798 = vst [vmem:[#allocation46_spill] sm:$0xff] %v3182_v47  ;;  %v1279_v0 = vmax.f32 %v1277_v8, %v3180_v36  ;;  %v1291_v15 = vmax.f32 %v1289_v48, %v3182_v47 }
 0x292   : > { %v3186_v7 = vpop.f32.mrb[30].mxu0  ;;  %v3188_v55 = vpop.f32.mrb[28].mxu1 }
 0x293   : > { %4799 = vst [vmem:[#allocation47_spill] sm:$0xff] %v3188_v55  ;;  %v1211_v9 = vmax.f32 %v1209_v22, %v3186_v7  ;;  %v1224_v31 = vmax.f32 %v1222_v4, %v3188_v55  ;;  %v3192_v62 = vpop.f32.mrb[31].mxu0  ;;  %v3194_v63 = vpop.f32.mrb[29].mxu1 }
 0x294   : > { %4800 = vst [vmem:[#allocation48_spill] sm:$0xff] %v3192_v62  ;;  %4801 = vst [vmem:[#allocation49_spill] sm:$0xff] %v3194_v63  ;;  %v1280_v24 = vmax.f32 %v1278_v40, %v3192_v62  ;;  %v1293_v54 = vmax.f32 %v1291_v15, %v3194_v63 }
 0x296   : > { %v3198_v46 = vpop.f32.mrb[32].mxu0  ;;  %v3200_v8 = vpop.f32.mrb[30].mxu1 }
 0x297   : > { %4802 = vst [vmem:[#allocation50_spill] sm:$0xff] %v3200_v8  ;;  %v1212_v48 = vmax.f32 %v1210_v56, %v3198_v46  ;;  %v1226_v47 = vmax.f32 %v1224_v31, %v3200_v8  ;;  %v3204_v38 = vpop.f32.mrb[33].mxu0  ;;  %v3206_v22 = vpop.f32.mrb[31].mxu1 }
 0x298   : > { %4803 = vst [vmem:[#allocation51_spill] sm:$0xff] %v3204_v38  ;;  %4804 = vst [vmem:[#allocation52_spill] sm:$0xff] %v3206_v22  ;;  %v1281_v4 = vmax.f32 %v1279_v0, %v3204_v38  ;;  %v1295_v30 = vmax.f32 %v1293_v54, %v3206_v22 }
 0x29a   : > { %v3210_v5 = vpop.f32.mrb[34].mxu0  ;;  %v3212_v40 = vpop.f32.mrb[32].mxu1 }
 0x29b   : > { %4805 = vst [vmem:[#allocation53_spill] sm:$0xff] %v3212_v40  ;;  %v1213_v15 = vmax.f32 %v1211_v9, %v3210_v5  ;;  %v1228_v63 = vmax.f32 %v1226_v47, %v3212_v40  ;;  %v3216_v19 = vpop.f32.mrb[35].mxu0  ;;  %v3218_v56 = vpop.f32.mrb[33].mxu1 }
 0x29c   : > { %4806 = vst [vmem:[#allocation54_spill] sm:$0xff] %v3216_v19  ;;  %4807 = vst [vmem:[#allocation55_spill] sm:$0xff] %v3218_v56  ;;  %v1282_v31 = vmax.f32 %v1280_v24, %v3216_v19  ;;  %v1297_v62 = vmax.f32 %v1295_v30, %v3218_v56 }
 0x29e   : > { %v3222_v36 = vpop.f32.mrb[36].mxu0  ;;  %v3224_v0 = vpop.f32.mrb[34].mxu1 }
 0x29f   : > { %4808 = vst [vmem:[#allocation56_spill] sm:$0xff] %v3224_v0  ;;  %v1214_v54 = vmax.f32 %v1212_v48, %v3222_v36  ;;  %v1230_v22 = vmax.f32 %v1228_v63, %v3224_v0  ;;  %v3228_v38 = vpop.f32.mrb[37].mxu0  ;;  %v3230_v9 = vpop.f32.mrb[35].mxu1 }
 0x2a0   : > { %4809 = vst [vmem:[#allocation57_spill] sm:$0xff] %v3228_v38  ;;  %4810 = vst [vmem:[#allocation58_spill] sm:$0xff] %v3230_v9  ;;  %v1283_v47 = vmax.f32 %v1281_v4, %v3228_v38  ;;  %v1299_v32 = vmax.f32 %v1297_v62, %v3230_v9 }
 0x2a2   : > { %v3234_v3 = vpop.f32.mrb[38].mxu0  ;;  %v3236_v24 = vpop.f32.mrb[36].mxu1 }
 0x2a3   : > { %4811 = vst [vmem:[#allocation59_spill] sm:$0xff] %v3236_v24  ;;  %v1215_v30 = vmax.f32 %v1213_v15, %v3234_v3  ;;  %v1232_v56 = vmax.f32 %v1230_v22, %v3236_v24  ;;  %v3240_v19 = vpop.f32.mrb[39].mxu0  ;;  %v3242_v48 = vpop.f32.mrb[37].mxu1 }
 0x2a4   : > { %4812 = vst [vmem:[#allocation60_spill] sm:$0xff] %v3240_v19  ;;  %4813 = vst [vmem:[#allocation61_spill] sm:$0xff] %v3242_v48  ;;  %v1284_v63 = vmax.f32 %v1282_v31, %v3240_v19  ;;  %v1301_v51 = vmax.f32 %v1299_v32, %v3242_v48 }
 0x2a6   : > { %v3246_v35 = vpop.f32.mrb[40].mxu0  ;;  %v3248_v4 = vpop.f32.mrb[38].mxu1 }
 0x2a7   : > { %4814 = vst [vmem:[#allocation62_spill] sm:$0xff] %v3248_v4  ;;  %v1216_v62 = vmax.f32 %v1214_v54, %v3246_v35  ;;  %v1234_v9 = vmax.f32 %v1232_v56, %v3248_v4  ;;  %v3252_v38 = vpop.f32.mrb[41].mxu0  ;;  %v3254_v15 = vpop.f32.mrb[39].mxu1  ;;  %v4896_v39 = vld [vmem:[#allocation57_spill] sm:$0xff] }
 0x2a8   : > { %4815 = vst [vmem:[#allocation63_spill] sm:$0xff] %v3252_v38  ;;  %4816 = vst [vmem:[#allocation64_spill] sm:$0xff] %v3254_v15  ;;  %v1285_v22 = vmax.f32 %v1283_v47, %v3252_v38  ;;  %v1303_v14 = vmax.f32 %v1301_v51, %v3254_v15 }
 0x2aa   : > { %v3258_v6 = vpop.f32.mrb[42].mxu0  ;;  %v3260_v31 = vpop.f32.mrb[40].mxu1 }
 0x2ab   : > { %4817 = vst [vmem:[#allocation65_spill] sm:$0xff] %v3260_v31  ;;  %v1217_v32 = vmax.f32 %v1215_v30, %v3258_v6  ;;  %v3263_v48 = vpop.f32.mrb[43].mxu0  ;;  %v3265_v19 = vpop.f32.mrb[41].mxu1 }
 0x2ac   : > { %4818 = vst [vmem:[#allocation66_spill] sm:$0xff] %v3263_v48  ;;  %4819 = vst [vmem:[#allocation67_spill] sm:$0xff] %v3265_v19  ;;  %v1286_v56 = vmax.f32 %v1284_v63, %v3263_v48 }
 0x2ad   : > { %v1236_v54 = vmax.f32 %v1234_v9, %v1217_v32 }
 0x2ae   : > { %v1305_v61 = vmax.f32 %v1303_v14, %v1286_v56  ;;  %v3268_v53 = vpop.f32.mrb[44].mxu0  ;;  %v3270_v45 = vpop.f32.mrb[42].mxu1 }
 0x2af   : > { %4820 = vst [vmem:[#allocation68_spill] sm:$0xff] %v3270_v45  ;;  %v1238_v51 = vmax.f32 %v1236_v54, %v3260_v31  ;;  %v1218_v47 = vmax.f32 %v1216_v62, %v3268_v53  ;;  %v3274_v15 = vpop.f32.mrb[45].mxu0  ;;  %v3276_v38 = vpop.f32.mrb[43].mxu1  ;;  %v4895_v31 = vld [vmem:[#allocation54_spill] sm:$0xff]  ;;  %v4898_v0 = vld [vmem:[#allocation63_spill] sm:$0xff] }
 0x2b0   : > { %4821 = vst [vmem:[#allocation69_spill] sm:$0xff] %v3274_v15  ;;  %4822 = vst [vmem:[#allocation70_spill] sm:$0xff] %v3276_v38  ;;  %v1307_v30 = vmax.f32 %v1305_v61, %v3265_v19  ;;  %v1287_v37 = vmax.f32 %v1285_v22, %v3274_v15 }
 0x2b1   : > { %v1240_v29 = vmax.f32 %v1238_v51, %v1218_v47 }
 0x2b2   : > { %v1309_v63 = vmax.f32 %v1307_v30, %v1287_v37  ;;  %v3280_v9 = vpop.f32.mrb[44].mxu1 }
 0x2b3   : > { %4823 = vst [vmem:[#allocation71_spill] sm:$0xff] %v3280_v9  ;;  %v1241_v14 = vmax.f32 %v3270_v45, %v1240_v29  ;;  %v3283_v32 = vpop.f32.mrb[45].mxu1  ;;  %v4894_v45 = vld [vmem:[#allocation51_spill] sm:$0xff]  ;;  %v4899_v40 = vld [vmem:[#allocation66_spill] sm:$0xff] }
 0x2b4   : > { %4824 = vst [vmem:[#allocation72_spill] sm:$0xff] %v3283_v32  ;;  %v1310_v56 = vmax.f32 %v3276_v38, %v1309_v63 }
 0x2b5   : > { %v1242_v62 = vmax.f32 %v3280_v9, %v1241_v14  ;;  %v4893_v9 = vld [vmem:[#allocation48_spill] sm:$0xff] }
 0x2b6   : > { %v1311_v54 = vmax.f32 %v3283_v32, %v1310_v56  ;;  %v3288_v48 = vpop.f32.mrb[46].mxu1 }
 0x2b7   : > { %4825 = vst [vmem:[#allocation73_spill] sm:$0xff] %v3288_v48  ;;  %v1243_v61 = vmax.f32 %v3288_v48, %v1242_v62  ;;  %v3291_v19 = vpop.f32.mrb[47].mxu1  ;;  %v4892_v48 = vld [vmem:[#allocation45_spill] sm:$0xff] }
 0x2b8   : > { %4826 = vst [vmem:[#allocation74_spill] sm:$0xff] %v3291_v19  ;;  %v1312_v37 = vmax.f32 %v3291_v19, %v1311_v54 }
 0x2ba   : > { %v3294_v22 = vpop.f32.mrb[48].mxu1 }
 0x2bb   : > { %4827 = vst [vmem:[#allocation75_spill] sm:$0xff] %v3294_v22  ;;  %v1244_v29 = vmax.f32 %v3294_v22, %v1243_v61  ;;  %v3297_v51 = vpop.f32.mrb[49].mxu1 }
 0x2bc   : > { %4828 = vst [vmem:[#allocation76_spill] sm:$0xff] %v3297_v51  ;;  %v1313_v47 = vmax.f32 %v3297_v51, %v1312_v37 }
 0x2be   : > { %v3300_v30 = vpop.f32.mrb[50].mxu1 }
 0x2bf   : > { %4829 = vst [vmem:[#allocation77_spill] sm:$0xff] %v3300_v30  ;;  %v1245_v63 = vmax.f32 %v3300_v30, %v1244_v29  ;;  %v3303_v14 = vpop.f32.mrb[51].mxu1 }
 0x2c0   : > { %4830 = vst [vmem:[#allocation78_spill] sm:$0xff] %v3303_v14  ;;  %v1314_v56 = vmax.f32 %v3303_v14, %v1313_v47 }
 0x2c2   : > { %v3306_v62 = vpop.f32.mrb[52].mxu1 }
 0x2c3   : > { %4831 = vst [vmem:[#allocation79_spill] sm:$0xff] %v3306_v62  ;;  %v1246_v54 = vmax.f32 %v3306_v62, %v1245_v63  ;;  %v3309_v19 = vpop.f32.mrb[53].mxu1 }
 0x2c4   : > { %4832 = vst [vmem:[#allocation80_spill] sm:$0xff] %v3309_v19  ;;  %v1315_v61 = vmax.f32 %v3309_v19, %v1314_v56 }
 0x2c6   : > { %v3312_v32 = vpop.f32.mrb[54].mxu1 }
 0x2c7   : > { %4833 = vst [vmem:[#allocation81_spill] sm:$0xff] %v3312_v32  ;;  %v1247_v37 = vmax.f32 %v3312_v32, %v1246_v54  ;;  %v3315_v51 = vpop.f32.mrb[55].mxu1 }
 0x2c8   : > { %4834 = vst [vmem:[#allocation82_spill] sm:$0xff] %v3315_v51  ;;  %v1316_v29 = vmax.f32 %v3315_v51, %v1315_v61 }
 0x2ca   : > { %v3318_v38 = vpop.f32.mrb[56].mxu1 }
 0x2cb   : > { %4835 = vst [vmem:[#allocation83_spill] sm:$0xff] %v3318_v38  ;;  %v1248_v47 = vmax.f32 %v3318_v38, %v1247_v37  ;;  %v3321_v14 = vpop.f32.mrb[57].mxu1 }
 0x2cc   : > { %4836 = vst [vmem:[#allocation84_spill] sm:$0xff] %v3321_v14  ;;  %v1317_v63 = vmax.f32 %v3321_v14, %v1316_v29 }
 0x2ce   : > { %v3324_v15 = vpop.f32.mrb[58].mxu1 }
 0x2cf   : > { %4837 = vst [vmem:[#allocation85_spill] sm:$0xff] %v3324_v15  ;;  %v1249_v56 = vmax.f32 %v3324_v15, %v1248_v47  ;;  %v3327_v19 = vpop.f32.mrb[59].mxu1 }
 0x2d0   : > { %4838 = vst [vmem:[#allocation86_spill] sm:$0xff] %v3327_v19  ;;  %v1318_v54 = vmax.f32 %v3327_v19, %v1317_v63 }
 0x2d2   : > { %v3330_v23 = vpop.f32.mrb[60].mxu1 }
 0x2d3   : > { %4839 = vst [vmem:[#allocation87_spill] sm:$0xff] %v3330_v23  ;;  %v1250_v61 = vmax.f32 %v3330_v23, %v1249_v56  ;;  %v3333_v51 = vpop.f32.mrb[61].mxu1 }
 0x2d4   : > { %4840 = vst [vmem:[#allocation88_spill] sm:$0xff] %v3333_v51  ;;  %v1319_v37 = vmax.f32 %v3333_v51, %v1318_v54 }
 0x2d6   : > { %v3336_v18 = vpop.f32.mrb[62].mxu1 }
 0x2d7   : > { %4841 = vst [vmem:[#allocation89_spill] sm:$0xff] %v3336_v18  ;;  %v1251_v29 = vmax.f32 %v3336_v18, %v1250_v61  ;;  %v3339_v14 = vpop.f32.mrb[63].mxu1 }
 0x2d8   : > { %4842 = vst [vmem:[#allocation90_spill] sm:$0xff] %v3339_v14  ;;  %v1320_v47 = vmax.f32 %v3339_v14, %v1319_v37 }
 0x2da   : > { %v3342_v15 = vpop.f32.mrb[64].mxu1 }
 0x2db   : > { %4843 = vst [vmem:[#allocation91_spill] sm:$0xff] %v3342_v15  ;;  %v1252_v63 = vmax.f32 %v3342_v15, %v1251_v29  ;;  %v3345_v19 = vpop.f32.mrb[65].mxu1 }
 0x2dc   : > { %4844 = vst [vmem:[#allocation92_spill] sm:$0xff] %v3345_v19  ;;  %v1321_v56 = vmax.f32 %v3345_v19, %v1320_v47 }
 0x2de   : > { %v3348_v23 = vpop.f32.mrb[66].mxu1 }
 0x2df   : > { %4845 = vst [vmem:[#allocation93_spill] sm:$0xff] %v3348_v23  ;;  %v1253_v54 = vmax.f32 %v3348_v23, %v1252_v63  ;;  %v3351_v51 = vpop.f32.mrb[67].mxu1 }
 0x2e0   : > { %4846 = vst [vmem:[#allocation94_spill] sm:$0xff] %v3351_v51  ;;  %v1322_v61 = vmax.f32 %v3351_v51, %v1321_v56 }
 0x2e2   : > { %v3354_v18 = vpop.f32.mrb[68].mxu1 }
 0x2e3   : > { %4847 = vst [vmem:[#allocation95_spill] sm:$0xff] %v3354_v18  ;;  %v1254_v37 = vmax.f32 %v3354_v18, %v1253_v54  ;;  %v3357_v14 = vpop.f32.mrb[69].mxu1 }
 0x2e4   : > { %4848 = vst [vmem:[#allocation96_spill] sm:$0xff] %v3357_v14  ;;  %v1323_v29 = vmax.f32 %v3357_v14, %v1322_v61 }
 0x2e6   : > { %v3360_v15 = vpop.f32.mrb[70].mxu1 }
 0x2e7   : > { %4849 = vst [vmem:[#allocation97_spill] sm:$0xff] %v3360_v15  ;;  %v1255_v47 = vmax.f32 %v3360_v15, %v1254_v37  ;;  %v3363_v19 = vpop.f32.mrb[71].mxu1 }
 0x2e8   : > { %4850 = vst [vmem:[#allocation98_spill] sm:$0xff] %v3363_v19  ;;  %v1324_v63 = vmax.f32 %v3363_v19, %v1323_v29 }
 0x2ea   : > { %v3366_v23 = vpop.f32.mrb[72].mxu1 }
 0x2eb   : > { %4851 = vst [vmem:[#allocation99_spill] sm:$0xff] %v3366_v23  ;;  %v1256_v56 = vmax.f32 %v3366_v23, %v1255_v47  ;;  %v3369_v51 = vpop.f32.mrb[73].mxu1  ;;  %v4935_v2 = vld [vmem:[#allocation96_spill] sm:$0xff] }
 0x2ec   : > { %4852 = vst [vmem:[#allocation100_spill] sm:$0xff] %v3369_v51  ;;  %v1325_v54 = vmax.f32 %v3369_v51, %v1324_v63 }
 0x2ee   : > { %v3372_v18 = vpop.f32.mrb[74].mxu1 }
 0x2ef   : > { %4853 = vst [vmem:[#allocation101_spill] sm:$0xff] %v3372_v18  ;;  %v1257_v61 = vmax.f32 %v3372_v18, %v1256_v56  ;;  %v3375_v14 = vpop.f32.mrb[75].mxu1  ;;  %v4936_v58 = vld [vmem:[#allocation98_spill] sm:$0xff] }
 0x2f0   : > { %4854 = vst [vmem:[#allocation102_spill] sm:$0xff] %v3375_v14  ;;  %v1326_v37 = vmax.f32 %v3375_v14, %v1325_v54 }
 0x2f2   : > { %v3378_v15 = vpop.f32.mrb[76].mxu1 }
 0x2f3   : > { %4855 = vst [vmem:[#allocation103_spill] sm:$0xff] %v3378_v15  ;;  %v1258_v29 = vmax.f32 %v3378_v15, %v1257_v61  ;;  %v3381_v19 = vpop.f32.mrb[77].mxu1 }
 0x2f4   : > { %4856 = vst [vmem:[#allocation104_spill] sm:$0xff] %v3381_v19  ;;  %v1327_v47 = vmax.f32 %v3381_v19, %v1326_v37 }
 0x2f6   : > { %v3384_v23 = vpop.f32.mrb[78].mxu1 }
 0x2f7   : > { %4857 = vst [vmem:[#allocation105_spill] sm:$0xff] %v3384_v23  ;;  %v1259_v63 = vmax.f32 %v3384_v23, %v1258_v29  ;;  %v3387_v51 = vpop.f32.mrb[79].mxu1  ;;  %v4938_v28 = vld [vmem:[#allocation102_spill] sm:$0xff] }
 0x2f8   : > { %4858 = vst [vmem:[#allocation106_spill] sm:$0xff] %v3387_v51  ;;  %v1328_v56 = vmax.f32 %v3387_v51, %v1327_v47 }
 0x2fa   : > { %v3390_v18 = vpop.f32.mrb[80].mxu1 }
 0x2fb   : > { %4859 = vst [vmem:[#allocation107_spill] sm:$0xff] %v3390_v18  ;;  %v1260_v54 = vmax.f32 %v3390_v18, %v1259_v63  ;;  %v3393_v14 = vpop.f32.mrb[81].mxu1  ;;  %v4939_v60 = vld [vmem:[#allocation104_spill] sm:$0xff] }
 0x2fc   : > { %4860 = vst [vmem:[#allocation108_spill] sm:$0xff] %v3393_v14  ;;  %v1329_v61 = vmax.f32 %v3393_v14, %v1328_v56  ;;  %v4887_v14 = vld [vmem:[#allocation30_spill] sm:$0xff] }
 0x2fe   : > { %v3396_v15 = vpop.f32.mrb[82].mxu1 }
 0x2ff   : > { %v1261_v37 = vmax.f32 %v3396_v15, %v1260_v54  ;;  %v3399_v19 = vpop.f32.mrb[83].mxu1  ;;  %v4886_v54 = vld [vmem:[#allocation27_spill] sm:$0xff]  ;;  %v4940_v34 = vld [vmem:[#allocation106_spill] sm:$0xff] }
 0x300   : > { %v1330_v29 = vmax.f32 %v3399_v19, %v1329_v61  ;;  %v4885_v61 = vld [vmem:[#allocation24_spill] sm:$0xff] }
 0x301   : > { %v1262_v23 = vrot.slane %v1261_v37, 4 }
 0x302   : > { %v1331_v38 = vrot.slane %v1330_v29, 4 }
 0x303   : > { %v1263_v32 = vmax.f32 %v1261_v37, %v1262_v23  ;;  %v4878_v37 = vld [vmem:[#allocation7_spill] sm:$0xff]  ;;  %v4891_v23 = vld [vmem:[#allocation42_spill] sm:$0xff] }
 0x304   : > { %v1332_v47 = vmax.f32 %v1330_v29, %v1331_v38  ;;  %v4882_v29 = vld [vmem:[#allocation18_spill] sm:$0xff] }
 0x305   : > { %v1264_v51 = vrot.slane %v1263_v32, 2 }
 0x306   : > { %v1333_v62 = vrot.slane %v1332_v47, 2 }
 0x307   : > { %v1265_v30 = vmax.f32 %v1263_v32, %v1264_v51  ;;  %v4888_v32 = vld [vmem:[#allocation33_spill] sm:$0xff]  ;;  %v4889_v51 = vld [vmem:[#allocation36_spill] sm:$0xff] }
 0x308   : > { %v1334_v63 = vmax.f32 %v1332_v47, %v1333_v62  ;;  %v4881_v47 = vld [vmem:[#allocation15_spill] sm:$0xff] }
 0x309   : > { %v1266_v18 = vrot.slane %v1265_v30, 1 }
 0x30a   : > { %v1335_v56 = vrot.slane %v1334_v63, 1 }
 0x30b   : > { %v3402_v22 = vmax.f32 %v1265_v30, %v1266_v18 }
 0x30c   : > { %v3440_v18 = vmax.f32 %v1334_v63, %v1335_v56  ;;  %v4879_v63 = vld [vmem:[#allocation9_spill] sm:$0xff]  ;;  %v4880_v56 = vld [vmem:[#allocation12_spill] sm:$0xff] }
 0x30d   : > { %v4883_v38 = vsub.f32 %v3396_v15, %v3402_v22  ;;  %v4890_v15 = vld [vmem:[#allocation39_spill] sm:$0xff]  ;;  %v4943_v13 = vsub.f32 %v3026_v20, %v3402_v22  ;;  %v4944_v11 = vsub.f32 %v3038_v25, %v3402_v22  ;;  %v4945_v8 = vsub.f32 %v3052_v33, %v3402_v22 }
 0x30e   : > { %v1464_v62 = vsub.f32 %v3399_v19, %v3440_v18  ;;  %v4884_v19 = vld [vmem:[#allocation21_spill] sm:$0xff]  ;;  %v4948_v25 = vsub.f32 %v3090_v57, %v3402_v22  ;;  %v4949_v26 = vsub.f32 %v3102_v1, %v3402_v22  ;;  %v4953_v1 = vsub.f32 %v3150_v59, %v3402_v22 }
 0x30f   : > { %v1717_v30 = vmul.f32 1.442695, %v4883_v38  ;;  %v4942_v38 = vsub.f32 %v3018_v16, %v3402_v22  ;;  %v1469_v50 = vmul.f32 1.442695, %v4943_v13  ;;  %v1473_v44 = vmul.f32 1.442695, %v4944_v11 }
 0x310   : > { %v1719_v24 = vmul.f32 1.442695, %v1464_v62  ;;  %v4897_v62 = vld [vmem:[#allocation60_spill] sm:$0xff]  ;;  %v1477_v55 = vmul.f32 1.442695, %v4945_v8  ;;  %v4947_v16 = vsub.f32 %v3078_v49, %v3402_v22  ;;  %v4951_v49 = vsub.f32 %v3126_v27, %v3402_v22 }
 0x311   : > { %2355 = vpow2.f32 %v1717_v30  ;;  %v1465_v4 = vmul.f32 1.442695, %v4942_v38  ;;  %v4946_v30 = vsub.f32 %v3066_v41, %v3402_v22  ;;  %v1489_v11 = vmul.f32 1.442695, %v4948_v25 }
 0x312   : > { %2357 = vpow2.f32 %v1719_v24  ;;  %v1485_v20 = vmul.f32 1.442695, %v4947_v16  ;;  %v1493_v33 = vmul.f32 1.442695, %v4949_v26  ;;  %v4950_v41 = vsub.f32 %v3114_v10, %v3402_v22 }
 0x313   : > { %v1481_v42 = vmul.f32 1.442695, %v4946_v30  ;;  %2359 = vpow2.f32 %v1465_v4  ;;  %v1501_v8 = vmul.f32 1.442695, %v4951_v49  ;;  %v4955_v24 = vsub.f32 %v3174_v52, %v3402_v22 }
 0x314   : > { %2361 = vpow2.f32 %v1469_v50  ;;  %v1497_v13 = vmul.f32 1.442695, %v4950_v41  ;;  %v4952_v50 = vsub.f32 %v3138_v43, %v3402_v22  ;;  %v4956_v59 = vsub.f32 %v3186_v7, %v3402_v22 }
 0x315   : > { %2363 = vpow2.f32 %v1473_v44  ;;  %v1509_v44 = vmul.f32 1.442695, %v4953_v1  ;;  %v1517_v43 = vmul.f32 1.442695, %v4955_v24  ;;  %v4958_v52 = vsub.f32 %v3210_v5, %v3402_v22 }
 0x316   : > { %2365 = vpow2.f32 %v1477_v55  ;;  %v1505_v57 = vmul.f32 1.442695, %v4952_v50  ;;  %v1521_v38 = vmul.f32 1.442695, %v4956_v59  ;;  %v4959_v7 = vsub.f32 %v3222_v36, %v3402_v22 }
 0x317   : > { %2367 = vpow2.f32 %v1481_v42  ;;  %v4954_v42 = vsub.f32 %v3162_v12, %v3402_v22  ;;  %v4957_v12 = vsub.f32 %v3198_v46, %v3402_v22  ;;  %v1529_v25 = vmul.f32 1.442695, %v4958_v52 }
 0x318   : > { %2369 = vpow2.f32 %v1485_v20  ;;  %v1533_v26 = vmul.f32 1.442695, %v4959_v7  ;;  %v4960_v46 = vsub.f32 %v3234_v3, %v3402_v22  ;;  %v4961_v5 = vsub.f32 %v3246_v35, %v3402_v22 }
 0x319   : > { %2371 = vpow2.f32 %v1489_v11  ;;  %v1513_v10 = vmul.f32 1.442695, %v4954_v42  ;;  %v1525_v16 = vmul.f32 1.442695, %v4957_v12  ;;  %v4962_v36 = vsub.f32 %v3258_v6, %v3402_v22 }
 0x31a   : > { %2373 = vpow2.f32 %v1493_v33  ;;  %v1537_v41 = vmul.f32 1.442695, %v4960_v46  ;;  %v1541_v49 = vmul.f32 1.442695, %v4961_v5  ;;  %v4963_v35 = vsub.f32 %v4878_v37, %v3440_v18 }
 0x31b   : > { %v3708_v55 = vpop.eup %2355  ;;  %2375 = vpow2.f32 %v1497_v13  ;;  %v1545_v50 = vmul.f32 1.442695, %v4962_v36  ;;  %v4964_v42 = vsub.f32 %v4879_v63, %v3440_v18  ;;  %v4965_v6 = vsub.f32 %v4880_v56, %v3440_v18 }
 0x31c   : > { %v3713_v27 = vpop.eup %2357  ;;  %2377 = vpow2.f32 %v1501_v8  ;;  %v4966_v59 = vsub.f32 %v4881_v47, %v3440_v18  ;;  %v4967_v37 = vsub.f32 %v4882_v29, %v3440_v18  ;;  %v4968_v56 = vsub.f32 %v4884_v19, %v3440_v18 }
 0x31d   : > { %v3718_v4 = vpop.eup %2359  ;;  %2379 = vpow2.f32 %v1505_v57  ;;  %v1475_v24 = vmul.f32 1.442695, %v4965_v6  ;;  %v4969_v47 = vsub.f32 %v4885_v61, %v3440_v18  ;;  %v4970_v29 = vsub.f32 %v4886_v54, %v3440_v18 }
 0x31e   : > { %v3723_v30 = vpop.eup %2361  ;;  %2381 = vpow2.f32 %v1509_v44  ;;  %v1467_v44 = vmul.f32 1.442695, %v4963_v35  ;;  %v1483_v63 = vmul.f32 1.442695, %v4967_v37  ;;  %v1487_v52 = vmul.f32 1.442695, %v4968_v56 }
 0x31f   : > { %v3728_v20 = vpop.eup %2363  ;;  %2383 = vpow2.f32 %v1513_v10  ;;  %v1471_v10 = vmul.f32 1.442695, %v4964_v42  ;;  %v1491_v7 = vmul.f32 1.442695, %v4969_v47  ;;  %v1495_v46 = vmul.f32 1.442695, %v4970_v29 }
 0x320   : > { %v3733_v11 = vpop.eup %2365  ;;  %2385 = vpow2.f32 %v1517_v43  ;;  %v4971_v19 = vsub.f32 %v4887_v14, %v3440_v18  ;;  %v4972_v61 = vsub.f32 %v4888_v32, %v3440_v18  ;;  %v4973_v54 = vsub.f32 %v4889_v51, %v3440_v18 }
 0x321   : > { %v3738_v33 = vpop.eup %2367  ;;  %2387 = vpow2.f32 %v1521_v38  ;;  %v1479_v38 = vmul.f32 1.442695, %v4966_v59  ;;  %v4974_v14 = vsub.f32 %v4890_v15, %v3440_v18  ;;  %v4975_v32 = vsub.f32 %v4891_v23, %v3440_v18 }
 0x322   : > { %v3743_v13 = vpop.eup %2369  ;;  %2389 = vpow2.f32 %v1525_v16  ;;  %v1499_v5 = vmul.f32 1.442695, %v4971_v19  ;;  %v1503_v36 = vmul.f32 1.442695, %v4972_v61  ;;  %v1507_v35 = vmul.f32 1.442695, %v4973_v54 }
 0x323   : > { %v3748_v8 = vpop.eup %2371  ;;  %2391 = vpow2.f32 %v1529_v25  ;;  %v1511_v42 = vmul.f32 1.442695, %v4974_v14  ;;  %v1515_v6 = vmul.f32 1.442695, %v4975_v32  ;;  %v4976_v51 = vsub.f32 %v4892_v48, %v3440_v18 }
 0x324   : > { %v3753_v57 = vpop.eup %2373  ;;  %2393 = vpow2.f32 %v1533_v26  ;;  %v4977_v15 = vsub.f32 %v4893_v9, %v3440_v18  ;;  %v4978_v56 = vsub.f32 %v4894_v45, %v3440_v18  ;;  %v4979_v47 = vsub.f32 %v4895_v31, %v3440_v18 }
 0x325   : > { %v3755_v3 = vpop.eup %2375  ;;  %2395 = vpow2.f32 %v1537_v41  ;;  %v1519_v59 = vmul.f32 1.442695, %v4976_v51  ;;  %v4980_v29 = vsub.f32 %v4896_v39, %v3440_v18  ;;  %v4981_v19 = vsub.f32 %v4897_v62, %v3440_v18  ;;  %v4987_v51 = vld [vmem:[#allocation11_spill] sm:$0xff] }
 0x326   : > { %v3757_v1 = vpop.eup %2377  ;;  %2397 = vpow2.f32 %v1541_v49  ;;  %v1523_v37 = vmul.f32 1.442695, %v4977_v15  ;;  %v1527_v23 = vmul.f32 1.442695, %v4978_v56  ;;  %v4982_v61 = vsub.f32 %v4898_v0, %v3440_v18 }
 0x327   : > { %v3768_v43 = vpop.eup %2379  ;;  %2399 = vpow2.f32 %v1545_v50  ;;  %v1539_v45 = vmul.f32 1.442695, %v4981_v19  ;;  %v4983_v54 = vsub.f32 %v3268_v53, %v3402_v22  ;;  %v4985_v62 = vsub.f32 %v3020_v17, %v3402_v22 }
 0x328   : > { %v3773_v12 = vpop.eup %2381  ;;  %2401 = vpow2.f32 %v1467_v44  ;;  %v1543_v31 = vmul.f32 1.442695, %v4982_v61  ;;  %v4986_v0 = vsub.f32 %v3028_v21, %v3402_v22 }
 0x329   : > { %v3778_v16 = vpop.eup %2383  ;;  %2403 = vpow2.f32 %v1471_v10  ;;  %v1549_v39 = vmul.f32 1.442695, %v4983_v54  ;;  %v1553_v32 = vmul.f32 1.442695, %v4985_v62 }
 0x32a   : > { %v3783_v25 = vpop.eup %2385  ;;  %2405 = vpow2.f32 %v1475_v24 }
 0x32b   : > { %v3788_v26 = vpop.eup %2387  ;;  %2407 = vpow2.f32 %v1479_v38 }
 0x32c   : > { %v3793_v41 = vpop.eup %2389  ;;  %2409 = vpow2.f32 %v1483_v63 }
 0x32d   : > { %v3798_v49 = vpop.eup %2391  ;;  %2411 = vpow2.f32 %v1487_v52 }
 0x32e   : > { %v3803_v50 = vpop.eup %2393  ;;  %2413 = vpow2.f32 %v1491_v7  ;;  %v1531_v7 = vmul.f32 1.442695, %v4979_v47 }
 0x32f   : > { %v3808_v44 = vpop.eup %2395  ;;  %2415 = vpow2.f32 %v1495_v46  ;;  %v1535_v46 = vmul.f32 1.442695, %v4980_v29 }
 0x330   : > { %v3813_v10 = vpop.eup %2397  ;;  %2417 = vpow2.f32 %v1499_v5 }
 0x331   : > { %v3818_v24 = vpop.eup %2399  ;;  %2419 = vpow2.f32 %v1503_v36 }
 0x332   : > { %v2402_v38 = vpop.eup %2401  ;;  %2421 = vpow2.f32 %v1507_v35  ;;  %v4984_v35 = vsub.f32 %v4899_v40, %v3440_v18  ;;  %v4989_v40 = vld [vmem:[#allocation69_spill] sm:$0xff] }
 0x333   : > { %v2404_v63 = vpop.eup %2403  ;;  %2423 = vpow2.f32 %v1511_v42 }
 0x334   : > { %v2406_v52 = vpop.eup %2405  ;;  %2425 = vpow2.f32 %v1515_v6  ;;  %v1547_v14 = vmul.f32 1.442695, %v4984_v35  ;;  %v1557_v6 = vmul.f32 1.442695, %v4986_v0  ;;  %v2143_v61 = vpack.c.bf16 %v2404_v63, %v2402_v38 }
 0x335   : > { %v2408_v48 = vpop.eup %2407  ;;  %2427 = vpow2.f32 %v1519_v59  ;;  %v4988_v59 = vsub.f32 %v4987_v51, %v3402_v22  ;;  %v2149_v35 = vpack.c.bf16 %v3733_v11, %v3728_v20  ;;  %v2153_v0 = vpack.c.bf16 %v3743_v13, %v3738_v33 }
 0x336   : > { %v3835_v9 = vpop.eup %2409  ;;  %2429 = vpow2.f32 %v1523_v37  ;;  %v4990_v37 = vsub.f32 %v4989_v40, %v3440_v18  ;;  %2144 = vmatprep.subr.bf16.mxu0 %v2143_v61  ;;  %v2161_v20 = vpack.c.bf16 %v3757_v1, %v3755_v3  ;;  %v2165_v33 = vpack.c.bf16 %v3773_v12, %v3768_v43  ;;  %v4999_v40 = vld [vmem:[#allocation16_spill] sm:$0xff] }
 0x337   : > { %v2412_v5 = vpop.eup %2411  ;;  %2431 = vpow2.f32 %v1527_v23  ;;  %v1561_v53 = vmul.f32 1.442695, %v4988_v59  ;;  %v4991_v23 = vld [vmem:[#allocation8_spill] sm:$0xff] }
 0x338   : > { %v3843_v36 = vpop.eup %2413  ;;  %2433 = vpow2.f32 %v1531_v7  ;;  %v1551_v56 = vmul.f32 1.442695, %v4990_v37  ;;  %v4992_v17 = vsub.f32 %v4991_v23, %v3440_v18  ;;  %v4993_v7 = vld [vmem:[#allocation10_spill] sm:$0xff]  ;;  %v2151_v62 = vpack.c.bf16 %v2412_v5, %v3835_v9  ;;  %v4995_v9 = vld [vmem:[#allocation13_spill] sm:$0xff] }
 0x339   : > { %v3851_v42 = vpop.eup %2415  ;;  %2435 = vpow2.f32 %v1535_v46  ;;  %v4994_v21 = vsub.f32 %v4993_v7, %v3440_v18  ;;  %v2145_v46 = vpack.c.bf16 %v3723_v30, %v3718_v4  ;;  %v2157_v4 = vpack.c.bf16 %v3753_v57, %v3748_v8 }
 0x33a   : > { %v3862_v15 = vpop.eup %2417  ;;  %2437 = vpow2.f32 %v1539_v45  ;;  %v1555_v47 = vmul.f32 1.442695, %v4992_v17  ;;  %v2147_v45 = vpack.c.bf16 %v2408_v48, %v2406_v52  ;;  %v2155_v38 = vpack.c.bf16 %v3851_v42, %v3843_v36  ;;  %v4997_v42 = vld [vmem:[#allocation14_spill] sm:$0xff] }
 0x33b   : > { %v1559_v29 = vmul.f32 1.442695, %v4994_v21  ;;  %v3873_v19 = vpop.eup %2419  ;;  %2439 = vpow2.f32 %v1543_v31  ;;  %2146 = vmatpush1.bf16.msra.mxu0 %v2145_v46  ;;  %v2169_v8 = vpack.c.bf16 %v3783_v25, %v3778_v16  ;;  %v2173_v57 = vpack.c.bf16 %v3793_v41, %v3788_v26 }
 0x33c   : > { %v3877_v54 = vpop.eup %2421  ;;  %2441 = vpow2.f32 %v1547_v14  ;;  %v2159_v30 = vpack.c.bf16 %v3873_v19, %v3862_v15  ;;  %2148 = vmatprep.subr.bf16.mxu0 %v2147_v45  ;;  %v2177_v52 = vpack.c.bf16 %v3803_v50, %v3798_v49  ;;  %v4996_v5 = vsub.f32 %v4995_v9, %v3440_v18  ;;  %v5067_v49 = vld [vmem:[#allocation65_spill] sm:$0xff] }
 0x33d   : > { %v3884_v51 = vpop.eup %2423  ;;  %2443 = vpow2.f32 %v1549_v39  ;;  %v5000_v37 = vsub.f32 %v4999_v40, %v3440_v18 }
 0x33e   : > { %v3892_v63 = vpop.eup %2425  ;;  %2445 = vpow2.f32 %v1551_v56  ;;  %v2163_v11 = vpack.c.bf16 %v3884_v51, %v3877_v54  ;;  %v1563_v31 = vmul.f32 1.442695, %v4996_v5 }
 0x33f   : > { %v3900_v13 = vpop.eup %2427  ;;  %2447 = vpow2.f32 %v1553_v32  ;;  %v4998_v32 = vsub.f32 %v4997_v42, %v3402_v22  ;;  %v1567_v56 = vmul.f32 1.442695, %v5000_v37  ;;  %2150 = vmatpush1.bf16.msra.mxu0 %v2149_v35  ;;  %v5005_v35 = vld [vmem:[#allocation20_spill] sm:$0xff]  ;;  %v5009_v37 = vld [vmem:[#allocation23_spill] sm:$0xff] }
 0x340   : > { %v3908_v48 = vpop.eup %2429  ;;  %2449 = vpow2.f32 %v1555_v47  ;;  %v2167_v36 = vpack.c.bf16 %v3900_v13, %v3892_v63  ;;  %v5001_v47 = vld [vmem:[#allocation17_spill] sm:$0xff]  ;;  %2152 = vmatprep.subr.bf16.mxu0 %v2151_v62  ;;  %v5006_v9 = vsub.f32 %v5005_v35, %v3402_v22 }
 0x341   : > { %v3917_v14 = vpop.eup %2431  ;;  %v1565_v59 = vmul.f32 1.442695, %v4998_v32  ;;  %2451 = vpow2.f32 %v1557_v6  ;;  %v5002_v7 = vsub.f32 %v5001_v47, %v3402_v22  ;;  %v5010_v47 = vsub.f32 %v5009_v37, %v3402_v22 }
 0x342   : > { %v3922_v15 = vpop.eup %2433  ;;  %2453 = vpow2.f32 %v1559_v29  ;;  %v2171_v23 = vpack.c.bf16 %v3917_v14, %v3908_v48  ;;  %v5003_v29 = vld [vmem:[#allocation19_spill] sm:$0xff]  ;;  %v1573_v5 = vmul.f32 1.442695, %v5006_v9  ;;  %v5013_v9 = vld [vmem:[#allocation26_spill] sm:$0xff] }
 0x343   : > { %v3929_v17 = vpop.eup %2435  ;;  %v1569_v21 = vmul.f32 1.442695, %v5002_v7  ;;  %2455 = vpow2.f32 %v1561_v53  ;;  %v5004_v19 = vsub.f32 %v5003_v29, %v3440_v18  ;;  %v5007_v53 = vld [vmem:[#allocation22_spill] sm:$0xff]  ;;  %2154 = vmatpush1.bf16.msra.mxu0 %v2153_v0  ;;  %v1577_v7 = vmul.f32 1.442695, %v5010_v47 }
 0x344   : > { %v3934_v6 = vpop.eup %2437  ;;  %2457 = vpow2.f32 %v1563_v31  ;;  %v2175_v46 = vpack.c.bf16 %v3929_v17, %v3922_v15  ;;  %v5008_v62 = vsub.f32 %v5007_v53, %v3440_v18  ;;  %2156 = vmatprep.subr.bf16.mxu0 %v2155_v38  ;;  %v5014_v53 = vsub.f32 %v5013_v9, %v3402_v22  ;;  %v5019_v9 = vld [vmem:[#allocation31_spill] sm:$0xff] }
 0x345   : > { %v1571_v61 = vmul.f32 1.442695, %v5004_v19  ;;  %v3941_v45 = vpop.eup %2439  ;;  %2459 = vpow2.f32 %v1565_v59 }
 0x346   : > { %v3946_v42 = vpop.eup %2441  ;;  %2461 = vpow2.f32 %v1567_v56  ;;  %v1575_v31 = vmul.f32 1.442695, %v5008_v62  ;;  %v5011_v56 = vld [vmem:[#allocation25_spill] sm:$0xff]  ;;  %v1581_v62 = vmul.f32 1.442695, %v5014_v53  ;;  %v5020_v53 = vsub.f32 %v5019_v9, %v3440_v18 }
 0x347   : > { %v3953_v40 = vpop.eup %2443  ;;  %2463 = vpow2.f32 %v1569_v21  ;;  %v5012_v29 = vsub.f32 %v5011_v56, %v3440_v18  ;;  %2158 = vmatpush1.bf16.msra.mxu0 %v2157_v4  ;;  %v5021_v4 = vld [vmem:[#allocation32_spill] sm:$0xff] }
 0x348   : > { %v3958_v59 = vpop.eup %2445  ;;  %2465 = vpow2.f32 %v1571_v61  ;;  %v5015_v61 = vld [vmem:[#allocation28_spill] sm:$0xff]  ;;  %2160 = vmatprep.subr.bf16.mxu0 %v2159_v30  ;;  %v5022_v38 = vsub.f32 %v5021_v4, %v3402_v22  ;;  %v5027_v4 = vld [vmem:[#allocation37_spill] sm:$0xff] }
 0x349   : > { %v1579_v19 = vmul.f32 1.442695, %v5012_v29  ;;  %v3965_v35 = vpop.eup %2447  ;;  %2467 = vpow2.f32 %v1573_v5  ;;  %v5016_v37 = vsub.f32 %v5015_v61, %v3440_v18  ;;  %v5017_v29 = vld [vmem:[#allocation29_spill] sm:$0xff] }
 0x34a   : > { %v3972_v21 = vpop.eup %2449  ;;  %2469 = vpow2.f32 %v1575_v31  ;;  %v5018_v0 = vsub.f32 %v5017_v29, %v3402_v22  ;;  %v1587_v31 = vmul.f32 1.442695, %v5020_v53  ;;  %v1589_v32 = vmul.f32 1.442695, %v5022_v38  ;;  %v5025_v53 = vld [vmem:[#allocation35_spill] sm:$0xff] }
 0x34b   : > { %v1583_v47 = vmul.f32 1.442695, %v5016_v37  ;;  %v3977_v56 = vpop.eup %2451  ;;  %2471 = vpow2.f32 %v1577_v7  ;;  %2162 = vmatpush1.bf16.msra.mxu0 %v2161_v20  ;;  %v5026_v38 = vsub.f32 %v5025_v53, %v3402_v22  ;;  %v5029_v20 = vld [vmem:[#allocation38_spill] sm:$0xff] }
 0x34c   : > { %v1585_v39 = vmul.f32 1.442695, %v5018_v0  ;;  %v3982_v5 = vpop.eup %2453  ;;  %2473 = vpow2.f32 %v1579_v19  ;;  %v2189_v61 = vpack.c.bf16 %v3977_v56, %v3965_v35  ;;  %v5023_v19 = vld [vmem:[#allocation34_spill] sm:$0xff]  ;;  %2164 = vmatprep.subr.bf16.mxu0 %v2163_v11  ;;  %v5030_v53 = vsub.f32 %v5029_v20, %v3402_v22  ;;  %v5031_v11 = vld [vmem:[#allocation40_spill] sm:$0xff] }
 0x34d   : > { %v3989_v37 = vpop.eup %2455  ;;  %2475 = vpow2.f32 %v1581_v62  ;;  %v2187_v30 = vpack.c.bf16 %v3982_v5, %v3972_v21  ;;  %v5024_v0 = vsub.f32 %v5023_v19, %v3440_v18  ;;  %v1593_v62 = vmul.f32 1.442695, %v5026_v38 }
 0x34e   : > { %v3996_v7 = vpop.eup %2457  ;;  %2477 = vpow2.f32 %v1583_v47  ;;  %v5028_v19 = vsub.f32 %v5027_v4, %v3440_v18 }
 0x34f   : > { %v1591_v29 = vmul.f32 1.442695, %v5024_v0  ;;  %v4004_v9 = vpop.eup %2459  ;;  %2479 = vpow2.f32 %v1585_v39  ;;  %v1597_v39 = vmul.f32 1.442695, %v5030_v53  ;;  %2166 = vmatpush1.bf16.msra.mxu0 %v2165_v33  ;;  %v5035_v53 = vld [vmem:[#allocation43_spill] sm:$0xff]  ;;  %v5037_v33 = vld [vmem:[#allocation44_spill] sm:$0xff] }
 0x350   : > { %v4012_v47 = vpop.eup %2461  ;;  %2481 = vpow2.f32 %v1587_v31  ;;  %v1595_v0 = vmul.f32 1.442695, %v5028_v19  ;;  %v2193_v3 = vpack.c.bf16 %v4004_v9, %v3989_v37  ;;  %v5032_v31 = vsub.f32 %v5031_v11, %v3440_v18  ;;  %v5033_v19 = vld [vmem:[#allocation41_spill] sm:$0xff]  ;;  %2168 = vmatprep.subr.bf16.mxu0 %v2167_v36  ;;  %v5039_v36 = vld [vmem:[#allocation46_spill] sm:$0xff] }
 0x351   : > { %v4019_v1 = vpop.eup %2463  ;;  %2483 = vpow2.f32 %v1589_v32  ;;  %v2191_v54 = vpack.c.bf16 %v4012_v47, %v3996_v7  ;;  %v5034_v20 = vsub.f32 %v5033_v19, %v3402_v22  ;;  %v5036_v11 = vsub.f32 %v5035_v53, %v3440_v18 }
 0x352   : > { %v4026_v51 = vpop.eup %2465  ;;  %2485 = vpow2.f32 %v1591_v29  ;;  %v1599_v38 = vmul.f32 1.442695, %v5032_v31  ;;  %v5038_v19 = vsub.f32 %v5037_v33, %v3402_v22 }
 0x353   : > { %v4034_v4 = vpop.eup %2467  ;;  %v1601_v32 = vmul.f32 1.442695, %v5034_v20  ;;  %2487 = vpow2.f32 %v1593_v62  ;;  %v1603_v31 = vmul.f32 1.442695, %v5036_v11  ;;  %2170 = vmatpush1.bf16.msra.mxu0 %v2169_v8  ;;  %v5041_v11 = vld [vmem:[#allocation47_spill] sm:$0xff]  ;;  %v5045_v8 = vld [vmem:[#allocation50_spill] sm:$0xff] }
 0x354   : > { %v4042_v29 = vpop.eup %2469  ;;  %2489 = vpow2.f32 %v1595_v0  ;;  %v2197_v43 = vpack.c.bf16 %v4034_v4, %v4019_v1  ;;  %v1605_v62 = vmul.f32 1.442695, %v5038_v19  ;;  %v5040_v0 = vsub.f32 %v5039_v36, %v3440_v18  ;;  %2172 = vmatprep.subr.bf16.mxu0 %v2171_v23  ;;  %v5043_v19 = vld [vmem:[#allocation49_spill] sm:$0xff]  ;;  %v5047_v23 = vld [vmem:[#allocation52_spill] sm:$0xff]  ;;  %v1725_v1 = vld [vmem:[%s3637_s11 + $0x20] sm:$0xff] }
 0x355   : > { %v4049_v12 = vpop.eup %2471  ;;  %2491 = vpow2.f32 %v1597_v39  ;;  %v2195_v63 = vpack.c.bf16 %v4042_v29, %v4026_v51  ;;  %v5042_v33 = vsub.f32 %v5041_v11, %v3402_v22  ;;  %v5044_v36 = vsub.f32 %v5043_v19, %v3440_v18 }
 0x356   : > { %v4056_v13 = vpop.eup %2473  ;;  %2493 = vpow2.f32 %v1599_v38  ;;  %v1607_v20 = vmul.f32 1.442695, %v5040_v0  ;;  %v5046_v11 = vsub.f32 %v5045_v8, %v3402_v22 }
 0x357   : > { %v4064_v53 = vpop.eup %2475  ;;  %v1609_v39 = vmul.f32 1.442695, %v5042_v33  ;;  %2495 = vpow2.f32 %v1601_v32  ;;  %v1611_v0 = vmul.f32 1.442695, %v5044_v36  ;;  %2174 = vmatpush1.bf16.msra.mxu0 %v2173_v57  ;;  %v5049_v36 = vld [vmem:[#allocation53_spill] sm:$0xff]  ;;  %v5053_v57 = vld [vmem:[#allocation56_spill] sm:$0xff] }
 0x358   : > { %v4072_v38 = vpop.eup %2477  ;;  %2497 = vpow2.f32 %v1603_v31  ;;  %v2201_v16 = vpack.c.bf16 %v4064_v53, %v4049_v12  ;;  %v1613_v32 = vmul.f32 1.442695, %v5046_v11  ;;  %v5048_v31 = vsub.f32 %v5047_v23, %v3440_v18  ;;  %2176 = vmatprep.subr.bf16.mxu0 %v2175_v46  ;;  %v5051_v11 = vld [vmem:[#allocation55_spill] sm:$0xff]  ;;  %v5055_v46 = vld [vmem:[#allocation58_spill] sm:$0xff] }
 0x359   : > { %v4079_v25 = vpop.eup %2479  ;;  %2499 = vpow2.f32 %v1605_v62  ;;  %v2199_v48 = vpack.c.bf16 %v4072_v38, %v4056_v13  ;;  %v5050_v8 = vsub.f32 %v5049_v36, %v3402_v22  ;;  %v5052_v23 = vsub.f32 %v5051_v11, %v3440_v18 }
 0x35a   : > { %v4086_v14 = vpop.eup %2481  ;;  %2501 = vpow2.f32 %v1607_v20  ;;  %v1615_v33 = vmul.f32 1.442695, %v5048_v31  ;;  %v5054_v36 = vsub.f32 %v5053_v57, %v3402_v22 }
 0x35b   : > { %v4094_v19 = vpop.eup %2483  ;;  %v1617_v62 = vmul.f32 1.442695, %v5050_v8  ;;  %2503 = vpow2.f32 %v1609_v39  ;;  %v1619_v31 = vmul.f32 1.442695, %v5052_v23  ;;  %2178 = vmatpush1.bf16.msra.mxu0 %v2177_v52  ;;  %v5057_v23 = vld [vmem:[#allocation59_spill] sm:$0xff]  ;;  %v5062_v52 = vld [vmem:[#allocation62_spill] sm:$0xff] }
 0x35c   : > { %v4102_v20 = vpop.eup %2485  ;;  %2505 = vpow2.f32 %v1611_v0  ;;  %v1621_v39 = vmul.f32 1.442695, %v5054_v36  ;;  %v5056_v0 = vsub.f32 %v5055_v46, %v3440_v18  ;;  %v5058_v57 = vsub.f32 %v5057_v23, %v3402_v22  ;;  %v5060_v46 = vld [vmem:[#allocation61_spill] sm:$0xff] }
 0x35d   : > { %v4109_v41 = vpop.eup %2487  ;;  %2507 = vpow2.f32 %v1613_v32  ;;  %v2203_v15 = vpack.c.bf16 %v4102_v20, %v4086_v14  ;;  %v5059_v36 = vpack.c.bf16 %v3941_v45, %v3934_v6  ;;  %v5063_v23 = vsub.f32 %v5062_v52, %v3402_v22 }
 0x35e   : > { %v4116_v17 = vpop.eup %2489  ;;  %2509 = vpow2.f32 %v1615_v33  ;;  %v1623_v8 = vmul.f32 1.442695, %v5056_v0  ;;  %v1625_v32 = vmul.f32 1.442695, %v5058_v57  ;;  %v5061_v0 = vsub.f32 %v5060_v46, %v3440_v18 }
 0x35f   : > { %v4124_v11 = vpop.eup %2491  ;;  %2511 = vpow2.f32 %v1617_v62  ;;  %2180 = vmatprep.subr.bf16.mxu0 %v5059_v36  ;;  %v1629_v62 = vmul.f32 1.442695, %v5063_v23  ;;  %v5066_v46 = vpack.c.bf16 %v3813_v10, %v3808_v44  ;;  %v5068_v52 = vsub.f32 %v5067_v49, %v3402_v22  ;;  %v5077_v44 = vld [vmem:[#allocation71_spill] sm:$0xff] }
 0x360   : > { %v4132_v33 = vpop.eup %2493  ;;  %2513 = vpow2.f32 %v1619_v31  ;;  %v1627_v26 = vmul.f32 1.442695, %v5061_v0  ;;  %v5064_v31 = vld [vmem:[#allocation64_spill] sm:$0xff]  ;;  %v5069_v23 = vpack.c.bf16 %v3958_v59, %v3946_v42 }
 0x361   : > { %v4139_v50 = vpop.eup %2495  ;;  %2515 = vpow2.f32 %v1621_v39  ;;  %v5065_v57 = vsub.f32 %v5064_v31, %v3440_v18  ;;  %2182 = vmatpush1.bf16.msra.mxu0 %v5066_v46  ;;  %v1633_v39 = vmul.f32 1.442695, %v5068_v52  ;;  %v5070_v31 = vld [vmem:[#allocation67_spill] sm:$0xff]  ;;  %v5072_v46 = vld [vmem:[#allocation68_spill] sm:$0xff]  ;;  %v5120_v14 = vpack.c.bf16 %v4132_v33, %v4116_v17 }
 0x362   : > { %v4146_v45 = vpop.eup %2497  ;;  %2517 = vpow2.f32 %v1623_v8  ;;  %2184 = vmatprep.subr.bf16.mxu0 %v5069_v23  ;;  %v5073_v49 = vsub.f32 %v5072_v46, %v3402_v22  ;;  %v5078_v46 = vsub.f32 %v5077_v44, %v3402_v22 }
 0x363   : > { %v1631_v36 = vmul.f32 1.442695, %v5065_v57  ;;  %v4154_v0 = vpop.eup %2499  ;;  %2519 = vpow2.f32 %v1625_v32  ;;  %v5071_v57 = vsub.f32 %v5070_v31, %v3440_v18  ;;  %v5076_v31 = vpack.c.bf16 %v3953_v40, %v3818_v24 }
 0x364   : > { %v4162_v8 = vpop.eup %2501  ;;  %2521 = vpow2.f32 %v1627_v26  ;;  %v1637_v32 = vmul.f32 1.442695, %v5073_v49  ;;  %v5074_v26 = vld [vmem:[#allocation70_spill] sm:$0xff]  ;;  %v5079_v49 = vld [vmem:[#allocation72_spill] sm:$0xff] }
 0x365   : > { %v1635_v6 = vmul.f32 1.442695, %v5071_v57  ;;  %v4169_v10 = vpop.eup %2503  ;;  %2523 = vpow2.f32 %v1629_v62  ;;  %v2211_v42 = vpack.c.bf16 %v4162_v8, %v4146_v45  ;;  %v5075_v52 = vsub.f32 %v5074_v26, %v3440_v18  ;;  %2186 = vmatpush1.bf16.msra.mxu0 %v5076_v31  ;;  %v5081_v31 = vld [vmem:[#allocation73_spill] sm:$0xff] }
 0x366   : > { %v4176_v59 = vpop.eup %2505  ;;  %2525 = vpow2.f32 %v1631_v36  ;;  %v1641_v62 = vmul.f32 1.442695, %v5078_v46  ;;  %2188 = vmatprep.subr.bf16.mxu0 %v2187_v30  ;;  %v5080_v26 = vsub.f32 %v5079_v49, %v3440_v18  ;;  %v5082_v44 = vsub.f32 %v5081_v31, %v3402_v22  ;;  %v5083_v30 = vld [vmem:[#allocation74_spill] sm:$0xff] }
 0x367   : > { %v1639_v23 = vmul.f32 1.442695, %v5075_v52  ;;  %v4184_v57 = vpop.eup %2507  ;;  %2527 = vpow2.f32 %v1633_v39 }
 0x368   : > { %v4192_v36 = vpop.eup %2509  ;;  %2529 = vpow2.f32 %v1635_v6  ;;  %v1643_v52 = vmul.f32 1.442695, %v5080_v26  ;;  %v2217_v24 = vpack.c.bf16 %v4184_v57, %v4169_v10  ;;  %v1645_v39 = vmul.f32 1.442695, %v5082_v44  ;;  %v5085_v26 = vld [vmem:[#allocation75_spill] sm:$0xff]  ;;  %v5087_v44 = vld [vmem:[#allocation76_spill] sm:$0xff] }
 0x369   : > { %v4199_v40 = vpop.eup %2511  ;;  %2531 = vpow2.f32 %v1637_v32  ;;  %v2215_v21 = vpack.c.bf16 %v4192_v36, %v4176_v59  ;;  %v5084_v6 = vsub.f32 %v5083_v30, %v3440_v18  ;;  %2190 = vmatpush1.bf16.msra.mxu0 %v2189_v61  ;;  %v5086_v31 = vsub.f32 %v5085_v26, %v3402_v22  ;;  %v5089_v61 = vld [vmem:[#allocation77_spill] sm:$0xff] }
 0x36a   : > { %v4206_v5 = vpop.eup %2513  ;;  %2533 = vpow2.f32 %v1639_v23  ;;  %2192 = vmatprep.subr.bf16.mxu0 %v2191_v54  ;;  %v5088_v30 = vsub.f32 %v5087_v44, %v3440_v18  ;;  %v5090_v26 = vsub.f32 %v5089_v61, %v3402_v22  ;;  %v5091_v54 = vld [vmem:[#allocation78_spill] sm:$0xff] }
 0x36b   : > { %v1647_v46 = vmul.f32 1.442695, %v5084_v6  ;;  %v4214_v49 = vpop.eup %2515  ;;  %v1649_v32 = vmul.f32 1.442695, %v5086_v31  ;;  %2535 = vpow2.f32 %v1641_v62 }
 0x36c   : > { %v4222_v23 = vpop.eup %2517  ;;  %2537 = vpow2.f32 %v1643_v52  ;;  %v1651_v6 = vmul.f32 1.442695, %v5088_v30  ;;  %v2221_v35 = vpack.c.bf16 %v4214_v49, %v4199_v40  ;;  %v1653_v62 = vmul.f32 1.442695, %v5090_v26  ;;  %v5093_v30 = vld [vmem:[#allocation79_spill] sm:$0xff]  ;;  %v5095_v26 = vld [vmem:[#allocation80_spill] sm:$0xff] }
 0x36d   : > { %v4229_v56 = vpop.eup %2519  ;;  %2539 = vpow2.f32 %v1645_v39  ;;  %v2219_v7 = vpack.c.bf16 %v4222_v23, %v4206_v5  ;;  %v5092_v52 = vsub.f32 %v5091_v54, %v3440_v18  ;;  %2194 = vmatpush1.bf16.msra.mxu0 %v2193_v3  ;;  %v5094_v61 = vsub.f32 %v5093_v30, %v3402_v22  ;;  %v5097_v3 = vld [vmem:[#allocation81_spill] sm:$0xff] }
 0x36e   : > { %v4236_v47 = vpop.eup %2521  ;;  %2541 = vpow2.f32 %v1647_v46  ;;  %2196 = vmatprep.subr.bf16.mxu0 %v2195_v63  ;;  %v5096_v54 = vsub.f32 %v5095_v26, %v3440_v18  ;;  %v5098_v30 = vsub.f32 %v5097_v3, %v3402_v22  ;;  %v5099_v63 = vld [vmem:[#allocation82_spill] sm:$0xff]  ;;  %v5147_v5 = vsub.f32 %v4940_v34, %v3440_v18 }
 0x36f   : > { %v1655_v31 = vmul.f32 1.442695, %v5092_v52  ;;  %v4244_v44 = vpop.eup %2523  ;;  %v1657_v39 = vmul.f32 1.442695, %v5094_v61  ;;  %2543 = vpow2.f32 %v1649_v32 }
 0x370   : > { %v4252_v46 = vpop.eup %2525  ;;  %2545 = vpow2.f32 %v1651_v6  ;;  %v1659_v52 = vmul.f32 1.442695, %v5096_v54  ;;  %v2225_v37 = vpack.c.bf16 %v4244_v44, %v4229_v56  ;;  %v1661_v32 = vmul.f32 1.442695, %v5098_v30  ;;  %v5101_v54 = vld [vmem:[#allocation83_spill] sm:$0xff]  ;;  %v5103_v30 = vld [vmem:[#allocation84_spill] sm:$0xff] }
 0x371   : > { %v4259_v9 = vpop.eup %2527  ;;  %2547 = vpow2.f32 %v1653_v62  ;;  %v2223_v51 = vpack.c.bf16 %v4252_v46, %v4236_v47  ;;  %v5100_v6 = vsub.f32 %v5099_v63, %v3440_v18  ;;  %2198 = vmatpush1.bf16.msra.mxu0 %v2197_v43  ;;  %v5102_v3 = vsub.f32 %v5101_v54, %v3402_v22  ;;  %v5105_v43 = vld [vmem:[#allocation85_spill] sm:$0xff] }
 0x372   : > { %v4266_v29 = vpop.eup %2529  ;;  %2549 = vpow2.f32 %v1655_v31  ;;  %2200 = vmatprep.subr.bf16.mxu0 %v2199_v48  ;;  %v5104_v63 = vsub.f32 %v5103_v30, %v3440_v18  ;;  %v5106_v54 = vsub.f32 %v5105_v43, %v3402_v22  ;;  %v5107_v48 = vld [vmem:[#allocation86_spill] sm:$0xff]  ;;  %v1711_v23 = vmul.f32 1.442695, %v5147_v5 }
 0x373   : > { %v1663_v61 = vmul.f32 1.442695, %v5100_v6  ;;  %v4274_v26 = vpop.eup %2531  ;;  %v1665_v62 = vmul.f32 1.442695, %v5102_v3  ;;  %2551 = vpow2.f32 %v1657_v39  ;;  %v1919_v5 = vld [vmem:[%s263_s28 + $0x18] sm:$0xff] }
 0x374   : > { %v4282_v31 = vpop.eup %2533  ;;  %2553 = vpow2.f32 %v1659_v52  ;;  %v1667_v6 = vmul.f32 1.442695, %v5104_v63  ;;  %v1669_v39 = vmul.f32 1.442695, %v5106_v54  ;;  %v5108_v52 = vsub.f32 %v5107_v48, %v3440_v18  ;;  %v5109_v63 = vld [vmem:[#allocation87_spill] sm:$0xff]  ;;  %v5111_v54 = vld [vmem:[#allocation88_spill] sm:$0xff] }
 0x375   : > { %v4289_v4 = vpop.eup %2535  ;;  %2555 = vpow2.f32 %v1661_v32  ;;  %v2227_v13 = vpack.c.bf16 %v4282_v31, %v4266_v29  ;;  %2202 = vmatpush1.bf16.msra.mxu0 %v2201_v16  ;;  %v5110_v43 = vsub.f32 %v5109_v63, %v3402_v22  ;;  %v5112_v48 = vsub.f32 %v5111_v54, %v3440_v18 }
 0x376   : > { %v4296_v38 = vpop.eup %2537  ;;  %2557 = vpow2.f32 %v1663_v61  ;;  %v1671_v3 = vmul.f32 1.442695, %v5108_v52  ;;  %2204 = vmatprep.subr.bf16.mxu0 %v2203_v15  ;;  %v5113_v52 = vld [vmem:[#allocation89_spill] sm:$0xff]  ;;  %v5115_v15 = vld [vmem:[#allocation90_spill] sm:$0xff]  ;;  %v5117_v54 = vpack.c.bf16 %v4094_v19, %v4079_v25 }
 0x377   : > { %v4304_v30 = vpop.eup %2539  ;;  %v1673_v32 = vmul.f32 1.442695, %v5110_v43  ;;  %2559 = vpow2.f32 %v1665_v62  ;;  %v1675_v12 = vmul.f32 1.442695, %v5112_v48  ;;  %v5114_v62 = vsub.f32 %v5113_v52, %v3402_v22  ;;  %v1721_v48 = vld [vmem:[%s3637_s11] sm:$0xff] }
 0x378   : > { %v4312_v61 = vpop.eup %2541  ;;  %2561 = vpow2.f32 %v1667_v6  ;;  %v5116_v6 = vsub.f32 %v5115_v15, %v3440_v18  ;;  %v5118_v52 = vld [vmem:[#allocation91_spill] sm:$0xff] }
 0x379   : > { %v4319_v16 = vpop.eup %2543  ;;  %v1677_v63 = vmul.f32 1.442695, %v5114_v62  ;;  %2563 = vpow2.f32 %v1669_v39  ;;  %2206 = vmatpush1.bf16.msra.mxu0 %v5117_v54  ;;  %v5119_v39 = vsub.f32 %v5118_v52, %v3402_v22  ;;  %v5127_v54 = vpack.c.bf16 %v4124_v11, %v4109_v41 }
 0x37a   : > { %v4326_v20 = vpop.eup %2545  ;;  %2565 = vpow2.f32 %v1671_v3  ;;  %v1679_v43 = vmul.f32 1.442695, %v5116_v6  ;;  %2208 = vmatprep.subr.bf16.mxu0 %v5120_v14  ;;  %v1726_v3 = vld [vmem:[%s3637_s11 + $0x28] sm:$0xff]  ;;  %v5125_v14 = vld [vmem:[#allocation94_spill] sm:$0xff]  ;;  %v5130_v41 = vsub.f32 %v4935_v2, %v3440_v18  ;;  %v5133_v2 = vsub.f32 %v4936_v58, %v3440_v18 }
 0x37b   : > { %v4335_v53 = vpop.eup %2547  ;;  %v1681_v62 = vmul.f32 1.442695, %v5119_v39  ;;  %2567 = vpow2.f32 %v1673_v32  ;;  %v5121_v6 = vld [vmem:[#allocation92_spill] sm:$0xff]  ;;  %v5123_v32 = vld [vmem:[#allocation93_spill] sm:$0xff]  ;;  %v5153_v56 = vpack.c.bf16 %v4312_v61, %v4296_v38 }
 0x37c   : > { %v4344_v15 = vpop.eup %2549  ;;  %2569 = vpow2.f32 %v1675_v12  ;;  %v5122_v25 = vsub.f32 %v5121_v6, %v3440_v18  ;;  %v5124_v39 = vsub.f32 %v5123_v32, %v3402_v22  ;;  %1798 = vmatmul.mubr.f32.vlgmr.msra.gmra.mrb[46].mxu0 %v1721_v48  ;;  %v5126_v6 = vsub.f32 %v5125_v14, %v3440_v18 }
 0x37d   : > { %v4351_v52 = vpop.eup %2551  ;;  %2571 = vpow2.f32 %v1677_v63  ;;  %v2235_v33 = vpack.c.bf16 %v4344_v15, %v4326_v20  ;;  %2210 = vmatpush1.bf16.msra.mxu0 %v5127_v54  ;;  %1803 = vmatprep.mubr.f32.mxu0 %v1726_v3  ;;  %v5128_v63 = vld [vmem:[#allocation95_spill] sm:$0xff]  ;;  %v1691_v11 = vmul.f32 1.442695, %v5130_v41  ;;  %v5155_v61 = vpack.c.bf16 %v4335_v53, %v4319_v16  ;;  %v1732_v53 = vld [vmem:[%s3637_s11 + $0x58] sm:$0x1] }
 0x37e   : > { %v1683_v19 = vmul.f32 1.442695, %v5122_v25  ;;  %v1685_v17 = vmul.f32 1.442695, %v5124_v39  ;;  %v4358_v12 = vpop.eup %2553  ;;  %2573 = vpow2.f32 %v1679_v43  ;;  %v1687_v25 = vmul.f32 1.442695, %v5126_v6  ;;  %2212 = vmatprep.subr.bf16.mxu0 %v2211_v42 }
 0x37f   : > { %v4367_v32 = vpop.eup %2555  ;;  %v5129_v48 = vsub.f32 %v5128_v63, %v3402_v22  ;;  %2575 = vpow2.f32 %v1681_v62  ;;  %v1730_v43 = vld [vmem:[%s3637_s11 + $0x48] sm:$0x1]  ;;  %v5131_v62 = vld [vmem:[#allocation97_spill] sm:$0xff]  ;;  %v5134_v63 = vpack.c.bf16 %v4154_v0, %v4139_v50 }
 0x380   : > { %v4376_v14 = vpop.eup %2557  ;;  %2577 = vpow2.f32 %v1683_v19  ;;  %v2241_v3 = vpack.c.bf16 %v4367_v32, %v4351_v52  ;;  %v5132_v6 = vsub.f32 %v5131_v62, %v3402_v22  ;;  %1804 = vmatmul.mubr.f32.gmra.mrb[48].mxu0 %v1725_v1  ;;  %v1695_v19 = vmul.f32 1.442695, %v5133_v2  ;;  %v1724_v1 = vld [vmem:[%s3637_s11 + $0x18] sm:$0xff]  ;;  %v1731_v16 = vld [vmem:[%s3637_s11 + $0x50] sm:$0x1] }
 0x381   : > { %v1689_v39 = vmul.f32 1.442695, %v5129_v48  ;;  %v4383_v54 = vpop.eup %2559  ;;  %2579 = vpow2.f32 %v1685_v17  ;;  %v2239_v8 = vpack.c.bf16 %v4376_v14, %v4358_v12  ;;  %2214 = vmatpush1.bf16.msra.mxu0 %v5134_v63  ;;  %1809 = vmatprep.mubr.f32.mxu0 %v1730_v43  ;;  %v1729_v48 = vld [vmem:[%s3637_s11 + $0x40] sm:$0x1]  ;;  %v5139_v63 = vld [vmem:[#allocation101_spill] sm:$0xff]  ;;  %v1904_v14 = vlaneseq }
 0x382   : > { %v1693_v45 = vmul.f32 1.442695, %v5132_v6  ;;  %v4390_v42 = vpop.eup %2561  ;;  %2581 = vpow2.f32 %v1687_v25  ;;  %v5135_v17 = vld [vmem:[#allocation99_spill] sm:$0xff]  ;;  %2216 = vmatprep.subr.bf16.mxu0 %v2215_v21  ;;  %v5137_v25 = vld [vmem:[#allocation100_spill] sm:$0xff]  ;;  %v5141_v21 = vsub.f32 %v4938_v28, %v3440_v18  ;;  %v5144_v28 = vsub.f32 %v4939_v60, %v3440_v18 }
 0x383   : > { %v4399_v41 = vpop.eup %2563  ;;  %v5136_v62 = vsub.f32 %v5135_v17, %v3402_v22  ;;  %2583 = vpow2.f32 %v1689_v39  ;;  %v5138_v50 = vsub.f32 %v5137_v25, %v3440_v18  ;;  %v5140_v39 = vsub.f32 %v5139_v63, %v3402_v22  ;;  %v5142_v25 = vld [vmem:[#allocation103_spill] sm:$0xff] }
 0x384   : > { %v4408_v58 = vpop.eup %2565  ;;  %2585 = vpow2.f32 %v1691_v11  ;;  %v2245_v43 = vpack.c.bf16 %v4399_v41, %v4383_v54  ;;  %1810 = vmatmul.mubr.f32.gmra.mrb[50].mxu0 %v1729_v48  ;;  %v1703_v11 = vmul.f32 1.442695, %v5141_v21  ;;  %v1707_v48 = vmul.f32 1.442695, %v5144_v28 }
 0x385   : > { %v1697_v6 = vmul.f32 1.442695, %v5136_v62  ;;  %v1699_v0 = vmul.f32 1.442695, %v5138_v50  ;;  %v4415_v2 = vpop.eup %2567  ;;  %v1701_v17 = vmul.f32 1.442695, %v5140_v39  ;;  %2587 = vpow2.f32 %v1693_v45  ;;  %2218 = vmatpush1.bf16.msra.mxu0 %v2217_v24  ;;  %1880 = vmatprep.mubr.f32.mxu0 %v1724_v1 }
 0x386   : > { %v2243_v59 = vpack.c.bf16 %v4408_v58, %v4390_v42  ;;  %v4422_v36 = vpop.eup %2569  ;;  %2589 = vpow2.f32 %v1695_v19  ;;  %v5143_v45 = vsub.f32 %v5142_v25, %v3402_v22  ;;  %2220 = vmatprep.subr.bf16.mxu0 %v2219_v7  ;;  %v5145_v24 = vld [vmem:[#allocation105_spill] sm:$0xff]  ;;  %v5148_v7 = vld [vmem:[#allocation107_spill] sm:$0xff]  ;;  %v5152_v25 = vpack.c.bf16 %v4274_v26, %v4259_v9 }
 0x387   : > { %v4430_v62 = vpop.eup %2571  ;;  %2591 = vpow2.f32 %v1697_v6  ;;  %v5146_v1 = vsub.f32 %v5145_v24, %v3402_v22  ;;  %v1901_v54 = vstv %s321_s12  ;;  %v1918_v24 = vld [vmem:[%s263_s28 + $0x10] sm:$0xff]  ;;  %s2712_s12 = smov [#allocation4]  }
 0x388   : > { %v1705_v50 = vmul.f32 1.442695, %v5143_v45  ;;  %v2574_v19 = vpop.eup %2573  ;;  %2593 = vpow2.f32 %v1699_v0  ;;  %v2249_v10 = vpack.c.bf16 %v4430_v62, %v4415_v2  ;;  %v5149_v0 = vsub.f32 %v5148_v7, %v3402_v22  ;;  %s2619_s15 = sshll.u32 %s2712_s12, 4  ;;  %s2620_s15 = int_to_ptr.vmem [resolvable:$false] %s2619_s15 }
 0x389   : > { %v2576_v57 = vpop.eup %2575  ;;  %v1709_v63 = vmul.f32 1.442695, %v5146_v1  ;;  %2595 = vpow2.f32 %v1701_v17  ;;  %v2247_v6 = vpack.c.bf16 %v2574_v19, %v4422_v36  ;;  %2222 = vmatpush1.bf16.msra.mxu0 %v2221_v35  ;;  %v5150_v36 = vld [vmem:[#allocation108_spill] sm:$0xff]  ;;  %s2621_s16 = scalar_lea.vmem %s2620_s15, 1024  ;;  %p2622_p5 = scmp.lt.s32.totalorder %s4507_s4, %s2620_s15 }
 0x38a   : > { %v2578_v39 = vpop.eup %2577  ;;  %2597 = vpow2.f32 %v1703_v11  ;;  %v1713_v2 = vmul.f32 1.442695, %v5149_v0  ;;  %2224 = vmatprep.subr.bf16.mxu0 %v2223_v51  ;;  %v5151_v34 = vsub.f32 %v5150_v36, %v3440_v18 }
 0x38b   : > { %v2580_v60 = vpop.eup %2579  ;;  %2599 = vpow2.f32 %v1705_v50 }
 0x38c   : > { %v2582_v17 = vpop.eup %2581  ;;  %2601 = vpow2.f32 %v1707_v48  ;;  %v1715_v21 = vmul.f32 1.442695, %v5151_v34  ;;  %v2253_v11 = vpack.c.bf16 %v2580_v60, %v2576_v57 }
 0x38d   : > { %v2584_v62 = vpop.eup %2583  ;;  %2603 = vpow2.f32 %v1709_v63  ;;  %v2251_v40 = vpack.c.bf16 %v2582_v17, %v2578_v39  ;;  %2226 = vmatpush1.bf16.msra.mxu0 %v2225_v37  ;;  %v1917_v39 = vld [vmem:[%s263_s28 + $0x8] sm:$0xff] }
 0x38e   : > { %v2586_v49 = vpop.eup %2585  ;;  %2605 = vpow2.f32 %v1711_v23  ;;  %2228 = vmatprep.subr.bf16.mxu0 %v2227_v13  ;;  %v5154_v13 = vpack.c.bf16 %v4304_v30, %v4289_v4  ;;  %v1727_v30 = vld [vmem:[%s3637_s11 + $0x30] sm:$0xff] }
 0x38f   : > { %v2588_v22 = vpop.eup %2587  ;;  %2607 = vpow2.f32 %v1713_v2 }
 0x390   : > { %v2590_v35 = vpop.eup %2589  ;;  %2609 = vpow2.f32 %v1715_v21  ;;  %v2257_v18 = vpack.c.bf16 %v2588_v22, %v2584_v62 }
 0x391   : > { %v2592_v47 = vpop.eup %2591  ;;  %v2255_v46 = vpack.c.bf16 %v2590_v35, %v2586_v49  ;;  %2230 = vmatpush1.bf16.msra.mxu0 %v5152_v25 }
 0x392   : > { %v2594_v51 = vpop.eup %2593  ;;  %2232 = vmatprep.subr.bf16.mxu0 %v5153_v56 }
 0x393   : > { %v2596_v45 = vpop.eup %2595 }
 0x394   : > { %v2598_v44 = vpop.eup %2597  ;;  %v2261_v37 = vpack.c.bf16 %v2596_v45, %v2592_v47 }
 0x395   : > { %v2600_v50 = vpop.eup %2599  ;;  %v2259_v29 = vpack.c.bf16 %v2598_v44, %v2594_v51  ;;  %2234 = vmatpush1.bf16.msra.mxu0 %v5154_v13 }
 0x396   : > { %v2602_v31 = vpop.eup %2601  ;;  %2236 = vmatprep.subr.bf16.mxu0 %v2235_v33 }
 0x397   : > { %v2604_v19 = vpop.eup %2603 }
 0x398   : > { %v2606_v9 = vpop.eup %2605  ;;  %v2265_v26 = vpack.c.bf16 %v2604_v19, %v2600_v50 }
 0x399   : > { %v2608_v28 = vpop.eup %2607  ;;  %v2263_v48 = vpack.c.bf16 %v2606_v9, %v2602_v31  ;;  %2238 = vmatpush1.bf16.msra.mxu0 %v5155_v61 }
 0x39a   : > { %v2610_v38 = vpop.eup %2609  ;;  %v2269_v57 = vpack.c.bf16 %v3708_v55, %v2608_v28  ;;  %2240 = vmatprep.subr.bf16.mxu0 %v2239_v8  ;;  %v1723_v55 = vld [vmem:[%s3637_s11 + $0x10] sm:$0xff] }
 0x39b   : > { %v2267_v4 = vpack.c.bf16 %v3713_v27, %v2610_v38  ;;  %v1728_v27 = vld [vmem:[%s3637_s11 + $0x38] sm:$0xff]  ;;  %s2615_s11 = scalar_lea.vmem %s4507_s4, 512 }
 0x39c   : > { %p2616_p2 = scmp.ne.s32.totalorder %s4507_s4, %s2615_s11  ;;  %p2623_p6 = scmp.lt.s32.totalorder %s2621_s16, %s2615_s11 }
 0x39d   : > { %2242 = vmatpush1.bf16.msra.mxu0 %v2241_v3  ;;  %v1905_v3 = vshrl.u32 %v1904_v14, 7 }
 0x39e   : > { %2244 = vmatprep.subr.bf16.mxu0 %v2243_v59  ;;  %p2617_p3 = pnand %p2616_p2, %p2809_p8  ;;  %p2624_p7 = por %p2623_p6, %p2622_p5 }
 0x39f   : > { %v1906_v8 = vsub.s32 0, %v1905_v3 }
 0x3a0   : > { %p2618_p4 = pneg %p2617_p3 }
 0x3a1   : > { %2246 = vmatpush1.bf16.msra.mxu0 %v2245_v43 }
 0x3a2   : > { %2248 = vmatprep.subr.bf16.mxu0 %v2247_v6  ;;  %p2625_p10 = pnand %p2624_p7, %p2618_p4 }
 0x3a5   : > { %2250 = vmatpush1.bf16.msra.mxu0 %v2249_v10  ;;  %v1916_v10 = vld [vmem:[%s263_s28] sm:$0xff] }
 0x3a6   : > { %2252 = vmatprep.subr.bf16.mxu0 %v2251_v40 }
 0x3a9   : > { %2254 = vmatpush1.bf16.msra.mxu0 %v2253_v11 }
 0x3aa   : > { %2256 = vmatprep.subr.bf16.mxu0 %v2255_v46 }
 0x3ad   : > { %2258 = vmatpush1.bf16.msra.mxu0 %v2257_v18 }
 0x3ae   : > { %2260 = vmatprep.subr.bf16.mxu0 %v2259_v29 }
 0x3b1   : > { %2262 = vmatpush1.bf16.msra.mxu0 %v2261_v37 }
 0x3b2   : > { %2264 = vmatprep.subr.bf16.mxu0 %v2263_v48 }
 0x3b5   : > { %2266 = vmatpush1.bf16.msra.mxu0 %v2265_v26 }
 0x3b6   : > { %2268 = vmatprep.subr.bf16.mxu0 %v2267_v4 }
 0x3b9   : > { %2270 = vmatpush1.bf16.msra.mxu0 %v2269_v57 }
 0x3bc   : > { %1881 = vmatmul.mubr.f32.vlgmr.msra.gmra.mrb[46].mxu0 %v1723_v55 }
 0x3bd   : > { %1886 = vmatprep.mubr.f32.mxu0 %v1728_v27 }
 0x3c0   : > { %1887 = vmatmul.mubr.f32.gmra.mrb[48].mxu0 %v1727_v30 }
 0x3c1   : > { %1892 = vmatprep.mubr.f32.mxu0 %v1732_v53 }
 0x3c4   : > { %1893 = vmatmul.mubr.f32.gmra.mrb[50].mxu0 %v1731_v16 }
 0x48f   : > { %v1882_v20 = vpop.f32.mrb[46].mxu0 }
 0x490   : > { %v1884_v15 = vpop.f32.mrb[47].mxu0 }
 0x493   : > { %v1888_v52 = vpop.f32.mrb[48].mxu0 }
 0x494   : > { %v1890_v33 = vpop.f32.mrb[49].mxu0 }
 0x497   : > { %v1894_v12 = vpop.f32.mrb[50].mxu0 }
 0x498   : > { %2611 = vrcp.f32 %v1894_v12  ;;  %v1896_v32 = vpop.f32.mrb[51].mxu0 }
 0x499   : > { %2613 = vrcp.f32 %v1896_v32 }
 0x4a2   : > { %v2612_v42 = vpop.eup %2611 }
 0x4a3   : > { %v2614_v41 = vpop.eup %2613  ;;  %v1902_v58 = vmul.f32 %v2612_v42, %v1901_v54 }
 0x4a4   : > { %v1903_v43 = vmul.f32 %v2614_v41, %v1901_v54 }
 0x4a5   : > { %v1907_v59 = vrot.slane %v1902_v58, %v1906_v8 }
 0x4a6   : > { %v1911_v1 = vrot.slane %v1903_v43, %v1906_v8 }
 0x4a7   : > { %v1912_v63 = vmul.f32 %v1907_v59, %v1882_v20  ;;  %v1914_v6 = vmul.f32 %v1907_v59, %v1888_v52 }
 0x4a8   : > { %v1913_v23 = vmul.f32 %v1911_v1, %v1884_v15  ;;  %v1915_v60 = vmul.f32 %v1911_v1, %v1890_v33 }
 0x4a9   : > { %v1920_v7 = vadd.f32 %v1916_v10, %v1912_v63  ;;  %v1922_v0 = vadd.f32 %v1918_v24, %v1914_v6 }
 0x4aa   : > { %v1921_v2 = vadd.f32 %v1917_v39, %v1913_v23  ;;  %v1923_v17 = vadd.f32 %v1919_v5, %v1915_v60 }
 0x4ab   : > { %1924 = vst [vmem:[%s297_s19] sm:$0xff] %v1920_v7  ;;  %1926 = vst [vmem:[%s297_s19 + $0x10] sm:$0xff] %v1922_v0 }
 0x4ac   : > { %1925 = vst [vmem:[%s297_s19 + $0x8] sm:$0xff] %v1921_v2  ;;  %1927 = vst [vmem:[%s297_s19 + $0x18] sm:$0xff] %v1923_v17 }
 0x4ad   : > { %2628 = shalt.err (!%p2625_p10)
}
 0x4ae   : > { %s2629_s14 = scalar_lea.hbm %s4512_s10, 512  ;;  %s2633_s19 = scalar_lea.hbm %s4573_s5, 2048 }
 0x4af   : > { %p2630_p11 = scmp.ne.s32.totalorder %s4512_s10, %s2629_s14  ;;  %p2634_p0 = scmp.lt.u32.totalorder %s4512_s10, %s4573_s5 }
 0x4b0   : > { %p2635_p1 = scmp.lt.u32.totalorder %s2633_s19, %s2629_s14  ;;  %p2637_p3 = scmp.lt.u32.totalorder %s2629_s14, %s4512_s10 }
 0x4b1   : > { %p2631_p12 = pnand %p2630_p11, %p2809_p8 }
 0x4b2   : > { %p2636_p2 = por %p2635_p1, %p2634_p0 }
 0x4b3   : > { %p2632_p13 = pneg %p2631_p12 }
 0x4b4   : > { %p2638_p4 = por %p2637_p3, %p2636_p2 }
 0x4b6   : > { %p2639_p5 = pnand %p2638_p4, %p2632_p13 }
 0x4b8   : > { %2642 = shalt.err (!%p2639_p5)
}
 0x4b9   : > { %s2713_s23 = smov 256   ;;  %s2714_s24 = smov 512  }
 0x4ba   : > { %s2715_s11 = smov 16  }
 0x4bb   : > { %2280 = dma.vmem_to_hbm [thread:$0]  (%p2809_p8), %s4507_s4, 512, %s4512_s10, %s4516_s7, %s2713_s23, %s2714_s24, %s2715_s11  }
 0x4bc PF: > { %p2286_p6 = scmp.ge.s32.totalorder %s2709_s27, 2  ;;  %s1959_s12 = sand.u32 1, %s2681_s20  }
 0x4bd   : > { %s1960_s15 = scalar_lea.sflag [#allocation5], %s1959_s12 }
 0x4be   : > { %p2283_p7 = pnand %p2286_p6, %p2813_p9 }
 0x4c0   : > { %2676 = dma.done.wait (!%p2283_p7), %s1960_s15, 512  }
 0x4c1   : > { %2678 = vsyncadd (!%p2283_p7), %s1960_s15, 4294966784  ;;  %s19_s27 = sadd.s32 1, %s2709_s27   ;;  %s5156_s20 = smov %s2685_s21 }
 0x4c2   : > { %p16_p10 = scmp.ge.s32.totalorder %s19_s27, 6   ;;  %s5157_s21 = smov %s2689_s22 }
 0x4c3   : > { %s5158_s22 = smov %s2821_s13  ;;  %s5159_s23 = smov %s2701_s25 }
 0x4c4   : > { %s5160_s24 = smov %s2705_s26  ;;  %s5161_s25 = smov %s5164_s29 }
 0x4c5   : > { %s5162_s26 = smov %s5168_s30  ;;  %18 = sbr.rel (!%p16_p10) target bundleno = 7 (0x7), region = 110 }
 0x4cc   :  { %1965 = vsyncpa [#allocation5], 1 }
 0x4cd   :  { %1967 = vsyncpa [#allocation5 + $0x1], 1 }

</bundles_post_ra>
